<compile_context>
chip_gen: v7x
topology: tpu7x:2x2x1
jax: 0.10.0
libtpu: 0.0.40
codegen_flags: <defaults>
</compile_context>

<pallas_src>
import functools

import jax
import jax.numpy as jnp
from jax import lax
from jax.experimental import pallas as pl
from jax.experimental.pallas import tpu as pltpu

HP = 128          # padded hidden size (lane width)
G4 = 4 * HP       # padded stacked gates (i, f, g, o)
IP = 128          # padded input feature dim (only used when input_size > 1)
OP = 128          # padded output dim (lane-dense output store)


def lstm_kernel(x_ref, wih_ref, whh_ref, b_ref, wlin_ref, blin_ref, out_ref,
                *, seq_len, input_is_scalar, out_is_scalar):
    # ---- input contribution to all gates, for every timestep -------------
    if input_is_scalar:
        # input_size == 1: outer product (S,1)*(1,4H) on the VPU (f32).
        xg = x_ref[...] * wih_ref[...] + b_ref[...]
    else:
        xg = jnp.dot(x_ref[...].astype(jnp.bfloat16), wih_ref[...],
                     preferred_element_type=jnp.float32) + b_ref[...]

    # Pre-split the per-step (1, 4H) gate rows BEFORE the recurrence: these
    # sublane extracts are h-independent, so keep them off the serial
    # critical path between the h-dependent matmul and the gate math.
    xg_rows = [xg[t:t + 1, :] for t in range(seq_len)]

    # ---- recurrence: h/c carried in vregs, statically unrolled -----------
    h = jnp.zeros((1, HP), jnp.float32)
    c = jnp.zeros((1, HP), jnp.float32)
    for t in range(seq_len):      # seq_len is a static Python int -> unroll
        # RHS fed directly from the VMEM ref (never held as a register-file
        # sized value across the loop); bf16 x bf16 -> single MXU pass with
        # f32 accumulation.
        gates = xg_rows[t] + jnp.dot(
            h.astype(jnp.bfloat16), whh_ref[...],
            preferred_element_type=jnp.float32)
        i = jax.nn.sigmoid(gates[:, 0 * HP:1 * HP])
        f = jax.nn.sigmoid(gates[:, 1 * HP:2 * HP])
        g = jnp.tanh(gates[:, 2 * HP:3 * HP])
        o = jax.nn.sigmoid(gates[:, 3 * HP:4 * HP])
        c = f * c + i * g
        h = o * jnp.tanh(c)

    # ---- final linear fused on the in-vreg last hidden state -------------
    if out_is_scalar:
        # O == 1: VPU multiply + XLU lane reduce; no MXU pass, no 64 KiB
        # mostly-zero weight DMA.  Broadcast to a lane-dense (1,128) store.
        y = jnp.sum(h * wlin_ref[...], axis=-1, keepdims=True)
        out_ref[...] = jnp.broadcast_to(y, out_ref.shape) + blin_ref[...]
    else:
        out_ref[...] = (jnp.dot(h.astype(jnp.bfloat16), wlin_ref[...],
                                preferred_element_type=jnp.float32)
                        + blin_ref[...])


def build_lstm_forward(w_ih, w_hh, b_ih, b_hh, w_lin, b_lin):
    """One-time weight padding/transpose/bf16 cast; returns jitted forward(x)."""
    f32, bf16 = jnp.float32, jnp.bfloat16
    H = w_hh.shape[1]
    I = w_ih.shape[1]
    O = w_lin.shape[0]
    assert I <= IP and H <= HP and O <= OP

    input_is_scalar = (I == 1)
    out_is_scalar = (O == 1)
    I_pad = 1 if input_is_scalar else IP

    # --- pad / transpose parameters ONCE (hoisted off the per-call path) --
    wihT_p = jnp.zeros((I_pad, G4), f32)
    whhT_p = jnp.zeros((HP, G4), f32)
    b_p = jnp.zeros((1, G4), f32)
    b_sum = (b_ih + b_hh).astype(f32)
    for g in range(4):
        wihT_p = wihT_p.at[:I, g * HP:g * HP + H].set(
            w_ih[g * H:(g + 1) * H, :].T.astype(f32))
        whhT_p = whhT_p.at[:H, g * HP:g * HP + H].set(
            w_hh[g * H:(g + 1) * H, :].T.astype(f32))
        b_p = b_p.at[0, g * HP:g * HP + H].set(b_sum[g * H:(g + 1) * H])

    # bf16 recurrent weights: single MXU pass per step, half the DMA/VMEM.
    whhT_p = whhT_p.astype(bf16)
    # Input weights: scalar-input path is a pure VPU outer product -> keep
    # f32; the general path feeds the MXU -> bf16.
    if not input_is_scalar:
        wihT_p = wihT_p.astype(bf16)

    if out_is_scalar:
        # Final linear as a single f32 (1, HP) row for the VPU/lane-reduce.
        wlin_p = jnp.zeros((1, HP), f32).at[0, :H].set(w_lin[0, :].astype(f32))
    else:
        wlin_p = jnp.zeros((HP, OP), bf16).at[:H, :O].set(w_lin.T.astype(bf16))
    blin_p = jnp.zeros((1, OP), f32).at[0, :O].set(b_lin.astype(f32))

    vmem = pl.BlockSpec(memory_space=pltpu.MemorySpace.VMEM)
    param_bytes = sum(int(a.size) * a.dtype.itemsize
                      for a in (wihT_p, whhT_p, b_p, wlin_p, blin_p))

    @jax.jit
    def forward(x):
        S = x.shape[0]
        assert x.shape[1] == I
        S_pad = max(8, -(-S // 8) * 8)
        x_p = jnp.zeros((S_pad, I_pad), f32).at[:S, :I].set(x.astype(f32))

        # Tiny, latency-bound kernel: tell XLA's scheduler so.
        input_flops = (2 * S * G4) if input_is_scalar else (2 * S * IP * G4)
        lin_flops = (2 * HP) if out_is_scalar else (2 * HP * OP)
        cost = pl.CostEstimate(
            flops=int(input_flops + 2 * S * HP * G4 + lin_flops),
            transcendentals=int(5 * S * HP),
            bytes_accessed=int(param_bytes + 4 * (x_p.size + OP)))

        # NOTE(long S): in-kernel xg is 2 KiB per timestep (f32), so this
        # gridless form stays within the 32 MiB default scoped VMEM up to
        # S ~ 15k even on v7x.  Only beyond that, tile S on an "arbitrary"
        # grid axis (h/c in VMEM scratch) and raise vmem_limit_bytes; do NOT
        # add time-chunking for short S (pure per-grid-step overhead).
        out = pl.pallas_call(
            functools.partial(lstm_kernel, seq_len=S,
                              input_is_scalar=input_is_scalar,
                              out_is_scalar=out_is_scalar),
            out_shape=jax.ShapeDtypeStruct((1, OP), f32),
            in_specs=[vmem] * 6,
            out_specs=vmem,
            cost_estimate=cost,
        )(x_p, wihT_p, whhT_p, b_p, wlin_p, blin_p)
        return out[0, :O]

    return forward


# ---------------- pure-JAX reference (for correctness check) --------------
def lstm_forward_ref(x, w_ih, w_hh, b_ih, b_hh, w_lin, b_lin):
    H = w_hh.shape[1]

    def step(carry, x_t):
        h, c = carry
        gates = x_t @ w_ih.T + b_ih + h @ w_hh.T + b_hh
        i, f, g, o = jnp.split(gates, 4)
        c = jax.nn.sigmoid(f) * c + jax.nn.sigmoid(i) * jnp.tanh(g)
        h = jax.nn.sigmoid(o) * jnp.tanh(c)
        return (h, c), h

    (h, _), _ = lax.scan(step, (jnp.zeros((H,)), jnp.zeros((H,))), x)
    return h @ w_lin.T + b_lin


if __name__ == "__main__":
    input_size, hidden, output_size = 1, 100, 1
    seq_len = 8

    key = jax.random.PRNGKey(0)
    ks = jax.random.split(key, 8)
    k = 1.0 / jnp.sqrt(hidden)

    # Deterministic init mirroring PyTorch's default U(-1/sqrt(H), 1/sqrt(H)).
    w_ih = jax.random.uniform(ks[0], (4 * hidden, input_size), minval=-k, maxval=k)
    w_hh = jax.random.uniform(ks[1], (4 * hidden, hidden), minval=-k, maxval=k)
    b_ih = jax.random.uniform(ks[2], (4 * hidden,), minval=-k, maxval=k)
    b_hh = jax.random.uniform(ks[3], (4 * hidden,), minval=-k, maxval=k)
    w_lin = jax.random.uniform(ks[4], (output_size, hidden), minval=-k, maxval=k)
    b_lin = jax.random.uniform(ks[5], (output_size,), minval=-k, maxval=k)

    # input_seq is a 1-D sequence; forward views it as (S, 1, input_size).
    input_seq = jax.random.normal(ks[6], (seq_len,), dtype=jnp.float32)
    x = input_seq.reshape(seq_len, input_size)

    forward = build_lstm_forward(w_ih, w_hh, b_ih, b_hh, w_lin, b_lin)
    pred = forward(x)
    jax.block_until_ready(pred)

    ref = lstm_forward_ref(x, w_ih, w_hh, b_ih, b_hh, w_lin, b_lin)
    assert pred.shape == (output_size,)
    # bf16 recurrent weights -> slightly looser tolerance than pure f32.
    assert jnp.allclose(pred, ref, atol=5e-3, rtol=5e-3), (pred, ref)

    print("KERNEL_OK")
</pallas_src>

<mosaic_0001>
module attributes {stable_mosaic.version = 11 : i64} {
  func.func @lstm_kernel(%arg0: memref<8x1xf32, #tpu.memory_space<vmem>>, %arg1: memref<1x512xf32, #tpu.memory_space<vmem>>, %arg2: memref<128x512xbf16, #tpu.memory_space<vmem>>, %arg3: memref<1x512xf32, #tpu.memory_space<vmem>>, %arg4: memref<1x128xf32, #tpu.memory_space<vmem>>, %arg5: memref<1x128xf32, #tpu.memory_space<vmem>>, %arg6: memref<1x128xf32, #tpu.memory_space<vmem>>) attributes {dimension_semantics = [], scalar_prefetch = 0 : i64, scratch_operands = 0 : i64, tpu.core_type = #tpu.core_type<tc>} {
    %c0 = arith.constant 0 : index
    %c0_0 = arith.constant 0 : index
    %0 = vector.load %arg0[%c0, %c0_0] : memref<8x1xf32, #tpu.memory_space<vmem>>, vector<8x1xf32>
    %c0_1 = arith.constant 0 : index
    %c0_2 = arith.constant 0 : index
    %1 = vector.load %arg1[%c0_1, %c0_2] : memref<1x512xf32, #tpu.memory_space<vmem>>, vector<1x512xf32>
    %2 = vector.broadcast %0 : vector<8x1xf32> to vector<8x512xf32>
    %3 = vector.broadcast %1 : vector<1x512xf32> to vector<8x512xf32>
    %4 = arith.mulf %2, %3 : vector<8x512xf32>
    %c0_3 = arith.constant 0 : index
    %c0_4 = arith.constant 0 : index
    %5 = vector.load %arg3[%c0_3, %c0_4] : memref<1x512xf32, #tpu.memory_space<vmem>>, vector<1x512xf32>
    %6 = vector.broadcast %5 : vector<1x512xf32> to vector<8x512xf32>
    %7 = arith.addf %4, %6 : vector<8x512xf32>
    %8 = vector.extract_strided_slice %7 {offsets = [0, 0], sizes = [1, 512], strides = [1, 1]} : vector<8x512xf32> to vector<1x512xf32>
    %9 = vector.extract_strided_slice %7 {offsets = [1, 0], sizes = [1, 512], strides = [1, 1]} : vector<8x512xf32> to vector<1x512xf32>
    %10 = vector.extract_strided_slice %7 {offsets = [2, 0], sizes = [1, 512], strides = [1, 1]} : vector<8x512xf32> to vector<1x512xf32>
    %11 = vector.extract_strided_slice %7 {offsets = [3, 0], sizes = [1, 512], strides = [1, 1]} : vector<8x512xf32> to vector<1x512xf32>
    %12 = vector.extract_strided_slice %7 {offsets = [4, 0], sizes = [1, 512], strides = [1, 1]} : vector<8x512xf32> to vector<1x512xf32>
    %13 = vector.extract_strided_slice %7 {offsets = [5, 0], sizes = [1, 512], strides = [1, 1]} : vector<8x512xf32> to vector<1x512xf32>
    %14 = vector.extract_strided_slice %7 {offsets = [6, 0], sizes = [1, 512], strides = [1, 1]} : vector<8x512xf32> to vector<1x512xf32>
    %15 = vector.extract_strided_slice %7 {offsets = [7, 0], sizes = [1, 512], strides = [1, 1]} : vector<8x512xf32> to vector<1x512xf32>
    %cst = arith.constant 0.000000e+00 : f32
    %16 = vector.broadcast %cst : f32 to vector<1x128xf32>
    %cst_5 = arith.constant 0.000000e+00 : f32
    %17 = vector.broadcast %cst_5 : f32 to vector<1x128xf32>
    %18 = arith.truncf %16 : vector<1x128xf32> to vector<1x128xbf16>
    %c0_6 = arith.constant 0 : index
    %c0_7 = arith.constant 0 : index
    %19 = vector.load %arg2[%c0_6, %c0_7] : memref<128x512xbf16, #tpu.memory_space<vmem>>, vector<128x512xbf16>
    %cst_8 = arith.constant dense<0.000000e+00> : vector<1x512xf32>
    %20 = tpu.matmul %18, %19, %cst_8 {dimension_numbers = #tpu.dot_dimension_numbers<[1], [0], [0], [1], [0, 0, 1, 1], [], []>} : vector<1x128xbf16>, vector<128x512xbf16>, vector<1x512xf32> -> vector<1x512xf32>
    %21 = arith.addf %8, %20 : vector<1x512xf32>
    %22 = vector.extract_strided_slice %21 {offsets = [0, 0], sizes = [1, 128], strides = [1, 1]} : vector<1x512xf32> to vector<1x128xf32>
    %23 = arith.negf %22 : vector<1x128xf32>
    %24 = math.exp %23 : vector<1x128xf32>
    %cst_9 = arith.constant 1.000000e+00 : f32
    %25 = vector.broadcast %cst_9 : f32 to vector<1x128xf32>
    %26 = arith.addf %25, %24 : vector<1x128xf32>
    %27 = arith.divf %25, %26 : vector<1x128xf32>
    %28 = vector.extract_strided_slice %21 {offsets = [0, 128], sizes = [1, 128], strides = [1, 1]} : vector<1x512xf32> to vector<1x128xf32>
    %29 = arith.negf %28 : vector<1x128xf32>
    %30 = math.exp %29 : vector<1x128xf32>
    %cst_10 = arith.constant 1.000000e+00 : f32
    %31 = vector.broadcast %cst_10 : f32 to vector<1x128xf32>
    %32 = arith.addf %31, %30 : vector<1x128xf32>
    %33 = arith.divf %31, %32 : vector<1x128xf32>
    %34 = vector.extract_strided_slice %21 {offsets = [0, 256], sizes = [1, 128], strides = [1, 1]} : vector<1x512xf32> to vector<1x128xf32>
    %35 = math.tanh %34 : vector<1x128xf32>
    %36 = vector.extract_strided_slice %21 {offsets = [0, 384], sizes = [1, 128], strides = [1, 1]} : vector<1x512xf32> to vector<1x128xf32>
    %37 = arith.negf %36 : vector<1x128xf32>
    %38 = math.exp %37 : vector<1x128xf32>
    %cst_11 = arith.constant 1.000000e+00 : f32
    %39 = vector.broadcast %cst_11 : f32 to vector<1x128xf32>
    %40 = arith.addf %39, %38 : vector<1x128xf32>
    %41 = arith.divf %39, %40 : vector<1x128xf32>
    %42 = arith.mulf %33, %17 : vector<1x128xf32>
    %43 = arith.mulf %27, %35 : vector<1x128xf32>
    %44 = arith.addf %42, %43 : vector<1x128xf32>
    %45 = math.tanh %44 : vector<1x128xf32>
    %46 = arith.mulf %41, %45 : vector<1x128xf32>
    %47 = arith.truncf %46 : vector<1x128xf32> to vector<1x128xbf16>
    %c0_12 = arith.constant 0 : index
    %c0_13 = arith.constant 0 : index
    %48 = vector.load %arg2[%c0_12, %c0_13] : memref<128x512xbf16, #tpu.memory_space<vmem>>, vector<128x512xbf16>
    %cst_14 = arith.constant dense<0.000000e+00> : vector<1x512xf32>
    %49 = tpu.matmul %47, %48, %cst_14 {dimension_numbers = #tpu.dot_dimension_numbers<[1], [0], [0], [1], [0, 0, 1, 1], [], []>} : vector<1x128xbf16>, vector<128x512xbf16>, vector<1x512xf32> -> vector<1x512xf32>
    %50 = arith.addf %9, %49 : vector<1x512xf32>
    %51 = vector.extract_strided_slice %50 {offsets = [0, 0], sizes = [1, 128], strides = [1, 1]} : vector<1x512xf32> to vector<1x128xf32>
    %52 = arith.negf %51 : vector<1x128xf32>
    %53 = math.exp %52 : vector<1x128xf32>
    %cst_15 = arith.constant 1.000000e+00 : f32
    %54 = vector.broadcast %cst_15 : f32 to vector<1x128xf32>
    %55 = arith.addf %54, %53 : vector<1x128xf32>
    %56 = arith.divf %54, %55 : vector<1x128xf32>
    %57 = vector.extract_strided_slice %50 {offsets = [0, 128], sizes = [1, 128], strides = [1, 1]} : vector<1x512xf32> to vector<1x128xf32>
    %58 = arith.negf %57 : vector<1x128xf32>
    %59 = math.exp %58 : vector<1x128xf32>
    %cst_16 = arith.constant 1.000000e+00 : f32
    %60 = vector.broadcast %cst_16 : f32 to vector<1x128xf32>
    %61 = arith.addf %60, %59 : vector<1x128xf32>
    %62 = arith.divf %60, %61 : vector<1x128xf32>
    %63 = vector.extract_strided_slice %50 {offsets = [0, 256], sizes = [1, 128], strides = [1, 1]} : vector<1x512xf32> to vector<1x128xf32>
    %64 = math.tanh %63 : vector<1x128xf32>
    %65 = vector.extract_strided_slice %50 {offsets = [0, 384], sizes = [1, 128], strides = [1, 1]} : vector<1x512xf32> to vector<1x128xf32>
    %66 = arith.negf %65 : vector<1x128xf32>
    %67 = math.exp %66 : vector<1x128xf32>
    %cst_17 = arith.constant 1.000000e+00 : f32
    %68 = vector.broadcast %cst_17 : f32 to vector<1x128xf32>
    %69 = arith.addf %68, %67 : vector<1x128xf32>
    %70 = arith.divf %68, %69 : vector<1x128xf32>
    %71 = arith.mulf %62, %44 : vector<1x128xf32>
    %72 = arith.mulf %56, %64 : vector<1x128xf32>
    %73 = arith.addf %71, %72 : vector<1x128xf32>
    %74 = math.tanh %73 : vector<1x128xf32>
    %75 = arith.mulf %70, %74 : vector<1x128xf32>
    %76 = arith.truncf %75 : vector<1x128xf32> to vector<1x128xbf16>
    %c0_18 = arith.constant 0 : index
    %c0_19 = arith.constant 0 : index
    %77 = vector.load %arg2[%c0_18, %c0_19] : memref<128x512xbf16, #tpu.memory_space<vmem>>, vector<128x512xbf16>
    %cst_20 = arith.constant dense<0.000000e+00> : vector<1x512xf32>
    %78 = tpu.matmul %76, %77, %cst_20 {dimension_numbers = #tpu.dot_dimension_numbers<[1], [0], [0], [1], [0, 0, 1, 1], [], []>} : vector<1x128xbf16>, vector<128x512xbf16>, vector<1x512xf32> -> vector<1x512xf32>
    %79 = arith.addf %10, %78 : vector<1x512xf32>
    %80 = vector.extract_strided_slice %79 {offsets = [0, 0], sizes = [1, 128], strides = [1, 1]} : vector<1x512xf32> to vector<1x128xf32>
    %81 = arith.negf %80 : vector<1x128xf32>
    %82 = math.exp %81 : vector<1x128xf32>
    %cst_21 = arith.constant 1.000000e+00 : f32
    %83 = vector.broadcast %cst_21 : f32 to vector<1x128xf32>
    %84 = arith.addf %83, %82 : vector<1x128xf32>
    %85 = arith.divf %83, %84 : vector<1x128xf32>
    %86 = vector.extract_strided_slice %79 {offsets = [0, 128], sizes = [1, 128], strides = [1, 1]} : vector<1x512xf32> to vector<1x128xf32>
    %87 = arith.negf %86 : vector<1x128xf32>
    %88 = math.exp %87 : vector<1x128xf32>
    %cst_22 = arith.constant 1.000000e+00 : f32
    %89 = vector.broadcast %cst_22 : f32 to vector<1x128xf32>
    %90 = arith.addf %89, %88 : vector<1x128xf32>
    %91 = arith.divf %89, %90 : vector<1x128xf32>
    %92 = vector.extract_strided_slice %79 {offsets = [0, 256], sizes = [1, 128], strides = [1, 1]} : vector<1x512xf32> to vector<1x128xf32>
    %93 = math.tanh %92 : vector<1x128xf32>
    %94 = vector.extract_strided_slice %79 {offsets = [0, 384], sizes = [1, 128], strides = [1, 1]} : vector<1x512xf32> to vector<1x128xf32>
    %95 = arith.negf %94 : vector<1x128xf32>
    %96 = math.exp %95 : vector<1x128xf32>
    %cst_23 = arith.constant 1.000000e+00 : f32
    %97 = vector.broadcast %cst_23 : f32 to vector<1x128xf32>
    %98 = arith.addf %97, %96 : vector<1x128xf32>
    %99 = arith.divf %97, %98 : vector<1x128xf32>
    %100 = arith.mulf %91, %73 : vector<1x128xf32>
    %101 = arith.mulf %85, %93 : vector<1x128xf32>
    %102 = arith.addf %100, %101 : vector<1x128xf32>
    %103 = math.tanh %102 : vector<1x128xf32>
    %104 = arith.mulf %99, %103 : vector<1x128xf32>
    %105 = arith.truncf %104 : vector<1x128xf32> to vector<1x128xbf16>
    %c0_24 = arith.constant 0 : index
    %c0_25 = arith.constant 0 : index
    %106 = vector.load %arg2[%c0_24, %c0_25] : memref<128x512xbf16, #tpu.memory_space<vmem>>, vector<128x512xbf16>
    %cst_26 = arith.constant dense<0.000000e+00> : vector<1x512xf32>
    %107 = tpu.matmul %105, %106, %cst_26 {dimension_numbers = #tpu.dot_dimension_numbers<[1], [0], [0], [1], [0, 0, 1, 1], [], []>} : vector<1x128xbf16>, vector<128x512xbf16>, vector<1x512xf32> -> vector<1x512xf32>
    %108 = arith.addf %11, %107 : vector<1x512xf32>
    %109 = vector.extract_strided_slice %108 {offsets = [0, 0], sizes = [1, 128], strides = [1, 1]} : vector<1x512xf32> to vector<1x128xf32>
    %110 = arith.negf %109 : vector<1x128xf32>
    %111 = math.exp %110 : vector<1x128xf32>
    %cst_27 = arith.constant 1.000000e+00 : f32
    %112 = vector.broadcast %cst_27 : f32 to vector<1x128xf32>
    %113 = arith.addf %112, %111 : vector<1x128xf32>
    %114 = arith.divf %112, %113 : vector<1x128xf32>
    %115 = vector.extract_strided_slice %108 {offsets = [0, 128], sizes = [1, 128], strides = [1, 1]} : vector<1x512xf32> to vector<1x128xf32>
    %116 = arith.negf %115 : vector<1x128xf32>
    %117 = math.exp %116 : vector<1x128xf32>
    %cst_28 = arith.constant 1.000000e+00 : f32
    %118 = vector.broadcast %cst_28 : f32 to vector<1x128xf32>
    %119 = arith.addf %118, %117 : vector<1x128xf32>
    %120 = arith.divf %118, %119 : vector<1x128xf32>
    %121 = vector.extract_strided_slice %108 {offsets = [0, 256], sizes = [1, 128], strides = [1, 1]} : vector<1x512xf32> to vector<1x128xf32>
    %122 = math.tanh %121 : vector<1x128xf32>
    %123 = vector.extract_strided_slice %108 {offsets = [0, 384], sizes = [1, 128], strides = [1, 1]} : vector<1x512xf32> to vector<1x128xf32>
    %124 = arith.negf %123 : vector<1x128xf32>
    %125 = math.exp %124 : vector<1x128xf32>
    %cst_29 = arith.constant 1.000000e+00 : f32
    %126 = vector.broadcast %cst_29 : f32 to vector<1x128xf32>
    %127 = arith.addf %126, %125 : vector<1x128xf32>
    %128 = arith.divf %126, %127 : vector<1x128xf32>
    %129 = arith.mulf %120, %102 : vector<1x128xf32>
    %130 = arith.mulf %114, %122 : vector<1x128xf32>
    %131 = arith.addf %129, %130 : vector<1x128xf32>
    %132 = math.tanh %131 : vector<1x128xf32>
    %133 = arith.mulf %128, %132 : vector<1x128xf32>
    %134 = arith.truncf %133 : vector<1x128xf32> to vector<1x128xbf16>
    %c0_30 = arith.constant 0 : index
    %c0_31 = arith.constant 0 : index
    %135 = vector.load %arg2[%c0_30, %c0_31] : memref<128x512xbf16, #tpu.memory_space<vmem>>, vector<128x512xbf16>
    %cst_32 = arith.constant dense<0.000000e+00> : vector<1x512xf32>
    %136 = tpu.matmul %134, %135, %cst_32 {dimension_numbers = #tpu.dot_dimension_numbers<[1], [0], [0], [1], [0, 0, 1, 1], [], []>} : vector<1x128xbf16>, vector<128x512xbf16>, vector<1x512xf32> -> vector<1x512xf32>
    %137 = arith.addf %12, %136 : vector<1x512xf32>
    %138 = vector.extract_strided_slice %137 {offsets = [0, 0], sizes = [1, 128], strides = [1, 1]} : vector<1x512xf32> to vector<1x128xf32>
    %139 = arith.negf %138 : vector<1x128xf32>
    %140 = math.exp %139 : vector<1x128xf32>
    %cst_33 = arith.constant 1.000000e+00 : f32
    %141 = vector.broadcast %cst_33 : f32 to vector<1x128xf32>
    %142 = arith.addf %141, %140 : vector<1x128xf32>
    %143 = arith.divf %141, %142 : vector<1x128xf32>
    %144 = vector.extract_strided_slice %137 {offsets = [0, 128], sizes = [1, 128], strides = [1, 1]} : vector<1x512xf32> to vector<1x128xf32>
    %145 = arith.negf %144 : vector<1x128xf32>
    %146 = math.exp %145 : vector<1x128xf32>
    %cst_34 = arith.constant 1.000000e+00 : f32
    %147 = vector.broadcast %cst_34 : f32 to vector<1x128xf32>
    %148 = arith.addf %147, %146 : vector<1x128xf32>
    %149 = arith.divf %147, %148 : vector<1x128xf32>
    %150 = vector.extract_strided_slice %137 {offsets = [0, 256], sizes = [1, 128], strides = [1, 1]} : vector<1x512xf32> to vector<1x128xf32>
    %151 = math.tanh %150 : vector<1x128xf32>
    %152 = vector.extract_strided_slice %137 {offsets = [0, 384], sizes = [1, 128], strides = [1, 1]} : vector<1x512xf32> to vector<1x128xf32>
    %153 = arith.negf %152 : vector<1x128xf32>
    %154 = math.exp %153 : vector<1x128xf32>
    %cst_35 = arith.constant 1.000000e+00 : f32
    %155 = vector.broadcast %cst_35 : f32 to vector<1x128xf32>
    %156 = arith.addf %155, %154 : vector<1x128xf32>
    %157 = arith.divf %155, %156 : vector<1x128xf32>
    %158 = arith.mulf %149, %131 : vector<1x128xf32>
    %159 = arith.mulf %143, %151 : vector<1x128xf32>
    %160 = arith.addf %158, %159 : vector<1x128xf32>
    %161 = math.tanh %160 : vector<1x128xf32>
    %162 = arith.mulf %157, %161 : vector<1x128xf32>
    %163 = arith.truncf %162 : vector<1x128xf32> to vector<1x128xbf16>
    %c0_36 = arith.constant 0 : index
    %c0_37 = arith.constant 0 : index
    %164 = vector.load %arg2[%c0_36, %c0_37] : memref<128x512xbf16, #tpu.memory_space<vmem>>, vector<128x512xbf16>
    %cst_38 = arith.constant dense<0.000000e+00> : vector<1x512xf32>
    %165 = tpu.matmul %163, %164, %cst_38 {dimension_numbers = #tpu.dot_dimension_numbers<[1], [0], [0], [1], [0, 0, 1, 1], [], []>} : vector<1x128xbf16>, vector<128x512xbf16>, vector<1x512xf32> -> vector<1x512xf32>
    %166 = arith.addf %13, %165 : vector<1x512xf32>
    %167 = vector.extract_strided_slice %166 {offsets = [0, 0], sizes = [1, 128], strides = [1, 1]} : vector<1x512xf32> to vector<1x128xf32>
    %168 = arith.negf %167 : vector<1x128xf32>
    %169 = math.exp %168 : vector<1x128xf32>
    %cst_39 = arith.constant 1.000000e+00 : f32
    %170 = vector.broadcast %cst_39 : f32 to vector<1x128xf32>
    %171 = arith.addf %170, %169 : vector<1x128xf32>
    %172 = arith.divf %170, %171 : vector<1x128xf32>
    %173 = vector.extract_strided_slice %166 {offsets = [0, 128], sizes = [1, 128], strides = [1, 1]} : vector<1x512xf32> to vector<1x128xf32>
    %174 = arith.negf %173 : vector<1x128xf32>
    %175 = math.exp %174 : vector<1x128xf32>
    %cst_40 = arith.constant 1.000000e+00 : f32
    %176 = vector.broadcast %cst_40 : f32 to vector<1x128xf32>
    %177 = arith.addf %176, %175 : vector<1x128xf32>
    %178 = arith.divf %176, %177 : vector<1x128xf32>
    %179 = vector.extract_strided_slice %166 {offsets = [0, 256], sizes = [1, 128], strides = [1, 1]} : vector<1x512xf32> to vector<1x128xf32>
    %180 = math.tanh %179 : vector<1x128xf32>
    %181 = vector.extract_strided_slice %166 {offsets = [0, 384], sizes = [1, 128], strides = [1, 1]} : vector<1x512xf32> to vector<1x128xf32>
    %182 = arith.negf %181 : vector<1x128xf32>
    %183 = math.exp %182 : vector<1x128xf32>
    %cst_41 = arith.constant 1.000000e+00 : f32
    %184 = vector.broadcast %cst_41 : f32 to vector<1x128xf32>
    %185 = arith.addf %184, %183 : vector<1x128xf32>
    %186 = arith.divf %184, %185 : vector<1x128xf32>
    %187 = arith.mulf %178, %160 : vector<1x128xf32>
    %188 = arith.mulf %172, %180 : vector<1x128xf32>
    %189 = arith.addf %187, %188 : vector<1x128xf32>
    %190 = math.tanh %189 : vector<1x128xf32>
    %191 = arith.mulf %186, %190 : vector<1x128xf32>
    %192 = arith.truncf %191 : vector<1x128xf32> to vector<1x128xbf16>
    %c0_42 = arith.constant 0 : index
    %c0_43 = arith.constant 0 : index
    %193 = vector.load %arg2[%c0_42, %c0_43] : memref<128x512xbf16, #tpu.memory_space<vmem>>, vector<128x512xbf16>
    %cst_44 = arith.constant dense<0.000000e+00> : vector<1x512xf32>
    %194 = tpu.matmul %192, %193, %cst_44 {dimension_numbers = #tpu.dot_dimension_numbers<[1], [0], [0], [1], [0, 0, 1, 1], [], []>} : vector<1x128xbf16>, vector<128x512xbf16>, vector<1x512xf32> -> vector<1x512xf32>
    %195 = arith.addf %14, %194 : vector<1x512xf32>
    %196 = vector.extract_strided_slice %195 {offsets = [0, 0], sizes = [1, 128], strides = [1, 1]} : vector<1x512xf32> to vector<1x128xf32>
    %197 = arith.negf %196 : vector<1x128xf32>
    %198 = math.exp %197 : vector<1x128xf32>
    %cst_45 = arith.constant 1.000000e+00 : f32
    %199 = vector.broadcast %cst_45 : f32 to vector<1x128xf32>
    %200 = arith.addf %199, %198 : vector<1x128xf32>
    %201 = arith.divf %199, %200 : vector<1x128xf32>
    %202 = vector.extract_strided_slice %195 {offsets = [0, 128], sizes = [1, 128], strides = [1, 1]} : vector<1x512xf32> to vector<1x128xf32>
    %203 = arith.negf %202 : vector<1x128xf32>
    %204 = math.exp %203 : vector<1x128xf32>
    %cst_46 = arith.constant 1.000000e+00 : f32
    %205 = vector.broadcast %cst_46 : f32 to vector<1x128xf32>
    %206 = arith.addf %205, %204 : vector<1x128xf32>
    %207 = arith.divf %205, %206 : vector<1x128xf32>
    %208 = vector.extract_strided_slice %195 {offsets = [0, 256], sizes = [1, 128], strides = [1, 1]} : vector<1x512xf32> to vector<1x128xf32>
    %209 = math.tanh %208 : vector<1x128xf32>
    %210 = vector.extract_strided_slice %195 {offsets = [0, 384], sizes = [1, 128], strides = [1, 1]} : vector<1x512xf32> to vector<1x128xf32>
    %211 = arith.negf %210 : vector<1x128xf32>
    %212 = math.exp %211 : vector<1x128xf32>
    %cst_47 = arith.constant 1.000000e+00 : f32
    %213 = vector.broadcast %cst_47 : f32 to vector<1x128xf32>
    %214 = arith.addf %213, %212 : vector<1x128xf32>
    %215 = arith.divf %213, %214 : vector<1x128xf32>
    %216 = arith.mulf %207, %189 : vector<1x128xf32>
    %217 = arith.mulf %201, %209 : vector<1x128xf32>
    %218 = arith.addf %216, %217 : vector<1x128xf32>
    %219 = math.tanh %218 : vector<1x128xf32>
    %220 = arith.mulf %215, %219 : vector<1x128xf32>
    %221 = arith.truncf %220 : vector<1x128xf32> to vector<1x128xbf16>
    %c0_48 = arith.constant 0 : index
    %c0_49 = arith.constant 0 : index
    %222 = vector.load %arg2[%c0_48, %c0_49] : memref<128x512xbf16, #tpu.memory_space<vmem>>, vector<128x512xbf16>
    %cst_50 = arith.constant dense<0.000000e+00> : vector<1x512xf32>
    %223 = tpu.matmul %221, %222, %cst_50 {dimension_numbers = #tpu.dot_dimension_numbers<[1], [0], [0], [1], [0, 0, 1, 1], [], []>} : vector<1x128xbf16>, vector<128x512xbf16>, vector<1x512xf32> -> vector<1x512xf32>
    %224 = arith.addf %15, %223 : vector<1x512xf32>
    %225 = vector.extract_strided_slice %224 {offsets = [0, 0], sizes = [1, 128], strides = [1, 1]} : vector<1x512xf32> to vector<1x128xf32>
    %226 = arith.negf %225 : vector<1x128xf32>
    %227 = math.exp %226 : vector<1x128xf32>
    %cst_51 = arith.constant 1.000000e+00 : f32
    %228 = vector.broadcast %cst_51 : f32 to vector<1x128xf32>
    %229 = arith.addf %228, %227 : vector<1x128xf32>
    %230 = arith.divf %228, %229 : vector<1x128xf32>
    %231 = vector.extract_strided_slice %224 {offsets = [0, 128], sizes = [1, 128], strides = [1, 1]} : vector<1x512xf32> to vector<1x128xf32>
    %232 = arith.negf %231 : vector<1x128xf32>
    %233 = math.exp %232 : vector<1x128xf32>
    %cst_52 = arith.constant 1.000000e+00 : f32
    %234 = vector.broadcast %cst_52 : f32 to vector<1x128xf32>
    %235 = arith.addf %234, %233 : vector<1x128xf32>
    %236 = arith.divf %234, %235 : vector<1x128xf32>
    %237 = vector.extract_strided_slice %224 {offsets = [0, 256], sizes = [1, 128], strides = [1, 1]} : vector<1x512xf32> to vector<1x128xf32>
    %238 = math.tanh %237 : vector<1x128xf32>
    %239 = vector.extract_strided_slice %224 {offsets = [0, 384], sizes = [1, 128], strides = [1, 1]} : vector<1x512xf32> to vector<1x128xf32>
    %240 = arith.negf %239 : vector<1x128xf32>
    %241 = math.exp %240 : vector<1x128xf32>
    %cst_53 = arith.constant 1.000000e+00 : f32
    %242 = vector.broadcast %cst_53 : f32 to vector<1x128xf32>
    %243 = arith.addf %242, %241 : vector<1x128xf32>
    %244 = arith.divf %242, %243 : vector<1x128xf32>
    %245 = arith.mulf %236, %218 : vector<1x128xf32>
    %246 = arith.mulf %230, %238 : vector<1x128xf32>
    %247 = arith.addf %245, %246 : vector<1x128xf32>
    %248 = math.tanh %247 : vector<1x128xf32>
    %249 = arith.mulf %244, %248 : vector<1x128xf32>
    %c0_54 = arith.constant 0 : index
    %c0_55 = arith.constant 0 : index
    %250 = vector.load %arg4[%c0_54, %c0_55] : memref<1x128xf32, #tpu.memory_space<vmem>>, vector<1x128xf32>
    %251 = arith.mulf %249, %250 : vector<1x128xf32>
    %cst_56 = arith.constant dense<0.000000e+00> : vector<1xf32>
    %252 = vector.multi_reduction <add>, %251, %cst_56 [1] : vector<1x128xf32> to vector<1xf32>
    %253 = vector.shape_cast %252 : vector<1xf32> to vector<1x1xf32>
    %254 = vector.shape_cast %253 : vector<1x1xf32> to vector<1x1xf32>
    %255 = vector.broadcast %254 : vector<1x1xf32> to vector<1x128xf32>
    %c0_57 = arith.constant 0 : index
    %c0_58 = arith.constant 0 : index
    %256 = vector.load %arg5[%c0_57, %c0_58] : memref<1x128xf32, #tpu.memory_space<vmem>>, vector<1x128xf32>
    %257 = arith.addf %255, %256 : vector<1x128xf32>
    %c0_59 = arith.constant 0 : index
    %c0_60 = arith.constant 0 : index
    %258 = vector.load %arg6[%c0_59, %c0_60] : memref<1x128xf32, #tpu.memory_space<vmem>>, vector<1x128xf32>
    tpu.vector_store %arg6[%c0_59, %c0_60], %257 {strides = array<i32>} : memref<1x128xf32, #tpu.memory_space<vmem>>, vector<1x128xf32>,
    return
  }
}

</mosaic_0001>

<bundles_post_ra>
// kernel: forward.1
= control target key start
LH: loop header
LB: loop body
LE: loop exit
PB: predicated region body
PF: predicated region fallthrough
CT: control target
= control target key end

     0   :  { %v1618_v2 = vmov 0   ;;  %s2266_s0 = inlined_call_operand.vmem [shape: f32[8,1], index: 0, kind: input, shape index: {}]   ;;  %s2267_s1 = inlined_call_operand.vmem [shape: f32[1,512], index: 1, kind: input, shape index: {}]   ;;  %s2268_s2 = inlined_call_operand.vmem [shape: bf16[128,512], index: 2, kind: input, shape index: {}]   ;;  %s2269_s3 = inlined_call_operand.vmem [shape: f32[1,512], index: 3, kind: input, shape index: {}]   ;;  %s2270_s4 = inlined_call_operand.vmem [shape: f32[1,128], index: 4, kind: input, shape index: {}]   ;;  %s2271_s5 = inlined_call_operand.vmem [shape: f32[1,128], index: 5, kind: input, shape index: {}]   ;;  %s2272_s6 = inlined_call_operand.hbm [shape: f32[1,128], index: 6, kind: output, shape index: {}]  }
   0x1   :  { %v1658_v0 = vld [vmem:[%s2268_s2 + $0x4] ss:$16 sps:$4 sm:$0xff]   ;;  %v1663_v1 = vld [vmem:[%s2268_s2 + $0xc] ss:$16 sps:$4 sm:$0xff]   ;;  %307 = vmatprep.mubr.bf16.mxu0 %v1618_v2  ;;  %348 = vmatprep.mubr.bf16.mxu1 %v1618_v2  ;;  %v1671_v3 = vld [vmem:[%s2268_s2] ss:$16 sps:$4 sm:$0xff]  }
   0x2   :  { %275 = vmatprep.subr.bf16.mxu0 %v1658_v0  ;;  %v1676_v4 = vld [vmem:[%s2268_s2 + $0x8] ss:$16 sps:$4 sm:$0xff]   ;;  %1385 = vset.pattern.permute.xlu0 %v1618_v2  ;;  %v1683_v5 = vld [vmem:[%s2268_s2 + $0x24] ss:$16 sps:$4 sm:$0xff]   ;;  %v1690_v6 = vld [vmem:[%s2268_s2 + $0x2c] ss:$16 sps:$4 sm:$0xff]  }
   0x3   :  { %316 = vmatprep.subr.bf16.mxu1 %v1663_v1  ;;  %276 = vmatpush1.bf16.msra.mxu0 %v1671_v3  ;;  %v1695_v7 = vld [vmem:[%s2268_s2 + $0x20] ss:$16 sps:$4 sm:$0xff]   ;;  %v1701_v8 = vld [vmem:[%s2268_s2 + $0x28] ss:$16 sps:$4 sm:$0xff]   ;;  %v1707_v9 = vld [vmem:[%s2268_s2 + $0x44] ss:$16 sps:$4 sm:$0xff]  }
   0x4   :  { %317 = vmatpush1.bf16.msra.mxu1 %v1676_v4  ;;  %277 = vmatprep.subr.bf16.mxu0 %v1683_v5  ;;  %v1712_v10 = vld [vmem:[%s2268_s2 + $0x4c] ss:$16 sps:$4 sm:$0xff]   ;;  %v1717_v11 = vld [vmem:[%s2268_s2 + $0x40] ss:$16 sps:$4 sm:$0xff]   ;;  %v1722_v12 = vld [vmem:[%s2268_s2 + $0x48] ss:$16 sps:$4 sm:$0xff]  }
   0x5   :  { %318 = vmatprep.subr.bf16.mxu1 %v1690_v6  ;;  %v1729_v13 = vld [vmem:[%s2268_s2 + $0x64] ss:$16 sps:$4 sm:$0xff]   ;;  %v1736_v14 = vld [vmem:[%s2268_s2 + $0x6c] ss:$16 sps:$4 sm:$0xff]   ;;  %v1741_v15 = vld [vmem:[%s2268_s2 + $0x60] ss:$16 sps:$4 sm:$0xff]  }
   0x6   :  { %v1748_v16 = vld [vmem:[%s2268_s2 + $0x68] ss:$16 sps:$4 sm:$0xff]   ;;  %v1753_v17 = vld [vmem:[%s2268_s2 + $0x84] ss:$16 sps:$4 sm:$0xff]   ;;  %v1760_v18 = vld [vmem:[%s2268_s2 + $0x8c] ss:$16 sps:$4 sm:$0xff]  }
   0x7   :  { %278 = vmatpush1.bf16.msra.mxu0 %v1695_v7  ;;  %v1765_v19 = vld [vmem:[%s2268_s2 + $0x80] ss:$16 sps:$4 sm:$0xff]   ;;  %v1770_v20 = vld [vmem:[%s2268_s2 + $0x88] ss:$16 sps:$4 sm:$0xff]   ;;  %v1777_v21 = vld [vmem:[%s2268_s2 + $0xa4] ss:$16 sps:$4 sm:$0xff]  }
   0x8   :  { %319 = vmatpush1.bf16.msra.mxu1 %v1701_v8  ;;  %279 = vmatprep.subr.bf16.mxu0 %v1707_v9  ;;  %v1784_v22 = vld [vmem:[%s2268_s2 + $0xac] ss:$16 sps:$4 sm:$0xff]   ;;  %v1791_v23 = vld [vmem:[%s2268_s2 + $0xa0] ss:$16 sps:$4 sm:$0xff]   ;;  %v1796_v24 = vld [vmem:[%s2268_s2 + $0xa8] ss:$16 sps:$4 sm:$0xff]  }
   0x9   :  { %320 = vmatprep.subr.bf16.mxu1 %v1712_v10  ;;  %v1803_v25 = vld [vmem:[%s2268_s2 + $0xc4] ss:$16 sps:$4 sm:$0xff]   ;;  %v1808_v26 = vld [vmem:[%s2268_s2 + $0xcc] ss:$16 sps:$4 sm:$0xff]  }
   0xa   :  { %v25_v27 = vld [vmem:[%s2266_s0] sm:$0xff] }
   0xb   :  { %280 = vmatpush1.bf16.msra.mxu0 %v1717_v11  ;;  %29 = vperm.xlu0 %1385, %v25_v27  }
   0xc   :  { %321 = vmatpush1.bf16.msra.mxu1 %v1722_v12  ;;  %281 = vmatprep.subr.bf16.mxu0 %v1729_v13 }
   0xd   :  { %322 = vmatprep.subr.bf16.mxu1 %v1736_v14 }
   0xf   :  { %282 = vmatpush1.bf16.msra.mxu0 %v1741_v15 }
  0x10   :  { %323 = vmatpush1.bf16.msra.mxu1 %v1748_v16  ;;  %283 = vmatprep.subr.bf16.mxu0 %v1753_v17 }
  0x11   :  { %324 = vmatprep.subr.bf16.mxu1 %v1760_v18 }
  0x13   :  { %284 = vmatpush1.bf16.msra.mxu0 %v1765_v19 }
  0x14   :  { %325 = vmatpush1.bf16.msra.mxu1 %v1770_v20  ;;  %285 = vmatprep.subr.bf16.mxu0 %v1777_v21 }
  0x15   :  { %326 = vmatprep.subr.bf16.mxu1 %v1784_v22 }
  0x16   :  { %11 = vsyncpa [#allocation3], 0  ;;  %v1818_v28 = vld [vmem:[%s2268_s2 + $0xc0] ss:$16 sps:$4 sm:$0xff]   ;;  %v1823_v29 = vld [vmem:[%s2268_s2 + $0xc8] ss:$16 sps:$4 sm:$0xff]   ;;  %v33_v34 = vlaneseq }
  0x17   :  { %286 = vmatpush1.bf16.msra.mxu0 %v1791_v23  ;;  %v1830_v30 = vld [vmem:[%s2268_s2 + $0xe4] ss:$16 sps:$4 sm:$0xff]   ;;  %v1835_v31 = vld [vmem:[%s2268_s2 + $0xec] ss:$16 sps:$4 sm:$0xff]   ;;  %v1842_v32 = vld [vmem:[%s2268_s2 + $0xe0] ss:$16 sps:$4 sm:$0xff]  }
  0x18   :  { %327 = vmatpush1.bf16.msra.mxu1 %v1796_v24  ;;  %287 = vmatprep.subr.bf16.mxu0 %v1803_v25  ;;  %v1847_v33 = vld [vmem:[%s2268_s2 + $0xe8] ss:$16 sps:$4 sm:$0xff]   ;;  %v34_v35 = vshrl.u32 %v33_v34, 7  ;;  %v26_v37 = vld [vmem:[%s2267_s1] sm:$0xf]  ;;  %vm1298_vm0 = vcmask 1047559  }
  0x19   :  { %328 = vmatprep.subr.bf16.mxu1 %v1808_v26  ;;  %v57_v41 = vld [vmem:[%s2269_s3] sm:$0xf]  ;;  %s1619_s29 = smov [#allocation2]  }
  0x1a   :  { %v35_v36 = vsub.s32 0, %v34_v35  ;;  %v39_v38 = vsub.s32 1, %v34_v35  ;;  %v47_v43 = vsub.s32 3, %v34_v35  ;;  %v43_v49 = vsub.s32 2, %v34_v35  ;;  %s1317_s30 = sshll.u32 %s1619_s29, 4  ;;  %s1318_s30 = int_to_ptr.vmem [resolvable:$true] %s1317_s30 }
  0x1b   :  { %288 = vmatpush1.bf16.msra.mxu0 %v1818_v28  ;;  %s1594_s0 = scalar_lea.vmem %s1318_s30, 16  ;;  %s1598_s7 = scalar_lea.vmem %s1318_s30, 32 }
  0x1c   :  { %329 = vmatpush1.bf16.msra.mxu1 %v1823_v29  ;;  %289 = vmatprep.subr.bf16.mxu0 %v1830_v30  ;;  %v36_v39 = vrot.slane %v26_v37, %v35_v36  ;;  %v40_v40 = vrot.slane %v26_v37, %v39_v38  ;;  %v62_v44 = vrot.slane %v57_v41, %v35_v36  ;;  %p1595_p0 = scmp.ne.s32.totalorder %s1318_s30, %s1594_s0  ;;  %p1599_p1 = scmp.lt.s32.totalorder %s1318_s30, %s1318_s30 }
  0x1d   :  { %330 = vmatprep.subr.bf16.mxu1 %v1835_v31  ;;  %v66_v46 = vrot.slane %v57_v41, %v39_v38  ;;  %v48_v48 = vrot.slane %v26_v37, %v47_v43  ;;  %v74_v52 = vrot.slane %v57_v41, %v47_v43  ;;  %v44_v56 = vrot.slane %v26_v37, %v43_v49  ;;  %p1600_p2 = scmp.lt.s32.totalorder %s1598_s7, %s1594_s0 }
  0x1e   :  { %v70_v38 = vrot.slane %v57_v41, %v43_v49 }
  0x1f   :  { %290 = vmatpush1.bf16.msra.mxu0 %v1842_v32  ;;  %p1601_p3 = por %p1600_p2, %p1599_p1 }
  0x20   :  { %331 = vmatpush1.bf16.msra.mxu1 %v1847_v33  ;;  %386 = vmatprep.subr.bf16.mxu0 %v1658_v0 }
  0x21   :  { %427 = vmatprep.subr.bf16.mxu1 %v1663_v1  ;;  %p1602_p4 = pnand %p1601_p3, %p1595_p0 }
  0x22   :  { %308 = vmatmul.mubr.bf16.vlgmr.msra.gmra.mrb[0].mxu0 %v1618_v2 }
  0x23   :  { %349 = vmatmul.mubr.bf16.vlgmr.msra.gmra.mrb[0].mxu1 %v1618_v2  ;;  %387 = vmatpush1.bf16.msra.mxu0 %v1671_v3 }
  0x24   :  { %428 = vmatpush1.bf16.msra.mxu1 %v1676_v4  ;;  %388 = vmatprep.subr.bf16.mxu0 %v1683_v5 }
  0x25   :  { %429 = vmatprep.subr.bf16.mxu1 %v1690_v6  ;;  %418 = vmatprep.mubr.bf16.mxu0 %v1618_v2 }
  0x26   :  { %459 = vmatprep.mubr.bf16.mxu1 %v1618_v2 }
  0x27   :  { %389 = vmatpush1.bf16.msra.mxu0 %v1695_v7 }
  0x28   :  { %430 = vmatpush1.bf16.msra.mxu1 %v1701_v8  ;;  %390 = vmatprep.subr.bf16.mxu0 %v1707_v9 }
  0x29   :  { %431 = vmatprep.subr.bf16.mxu1 %v1712_v10 }
  0x2b   :  { %391 = vmatpush1.bf16.msra.mxu0 %v1717_v11 }
  0x2c   :  { %432 = vmatpush1.bf16.msra.mxu1 %v1722_v12  ;;  %392 = vmatprep.subr.bf16.mxu0 %v1729_v13 }
  0x2d   :  { %433 = vmatprep.subr.bf16.mxu1 %v1736_v14 }
  0x2f   :  { %393 = vmatpush1.bf16.msra.mxu0 %v1741_v15 }
  0x30   :  { %434 = vmatpush1.bf16.msra.mxu1 %v1748_v16  ;;  %394 = vmatprep.subr.bf16.mxu0 %v1753_v17 }
  0x31   :  { %435 = vmatprep.subr.bf16.mxu1 %v1760_v18 }
  0x33   :  { %395 = vmatpush1.bf16.msra.mxu0 %v1765_v19 }
  0x34   :  { %436 = vmatpush1.bf16.msra.mxu1 %v1770_v20  ;;  %396 = vmatprep.subr.bf16.mxu0 %v1777_v21 }
  0x35   :  { %437 = vmatprep.subr.bf16.mxu1 %v1784_v22 }
  0x37   :  { %397 = vmatpush1.bf16.msra.mxu0 %v1791_v23 }
  0x38   :  { %438 = vmatpush1.bf16.msra.mxu1 %v1796_v24  ;;  %398 = vmatprep.subr.bf16.mxu0 %v1803_v25 }
  0x39   :  { %439 = vmatprep.subr.bf16.mxu1 %v1808_v26 }
  0x3b   :  { %399 = vmatpush1.bf16.msra.mxu0 %v1818_v28 }
  0x3c   :  { %440 = vmatpush1.bf16.msra.mxu1 %v1823_v29  ;;  %400 = vmatprep.subr.bf16.mxu0 %v1830_v30 }
  0x3d   :  { %441 = vmatprep.subr.bf16.mxu1 %v1835_v31 }
  0x3f   :  { %401 = vmatpush1.bf16.msra.mxu0 %v1842_v32 }
  0x40   :  { %442 = vmatpush1.bf16.msra.mxu1 %v1847_v33  ;;  %516 = vmatprep.subr.bf16.mxu0 %v1658_v0 }
  0x41   :  { %557 = vmatprep.subr.bf16.mxu1 %v1663_v1 }
  0x8a   :  { %v30_v42 = vpop.permute.xlu0 %29 }
  0x8b   :  { %v53_v45 = vmul.f32 %v36_v39, %v30_v42  ;;  %v54_v47 = vmul.f32 %v40_v40, %v30_v42  ;;  %v56_v53 = vmul.f32 %v48_v48, %v30_v42  ;;  %v55_v39 = vmul.f32 %v44_v56, %v30_v42 }
  0x8d   :  { %v1897_v50 = vadd.f32 %v62_v44, %v53_v45  ;;  %v1899_v51 = vadd.f32 %v66_v46, %v54_v47  ;;  %v1903_v35 = vadd.f32 %v74_v52, %v56_v53  ;;  %v1906_v40 = vadd.f32 %v70_v38, %v55_v39 }
  0xf5   :  { %v309_v54 = vpop.f32.mrb[0].mxu0 }
  0xf6   :  { %v350_v55 = vpop.f32.mrb[0].mxu1  ;;  %v357_v57 = vadd.f32 %v309_v54, %v1897_v50  ;;  %v311_v58 = vpop.f32.mrb[1].mxu0 }
  0xf7   :  { %v352_v59 = vpop.f32.mrb[1].mxu1  ;;  %v358_v60 = vadd.f32 %v311_v58, %v1899_v51  ;;  %v313_v61 = vpop.f32.mrb[2].mxu0  ;;  %v359_v44 = vadd.f32 %v350_v55, %v1906_v40 }
  0xf8   :  { %v354_v62 = vpop.f32.mrb[2].mxu1  ;;  %v1357_v63 = vmul.f32 -1.442695, %v357_v57  ;;  %v314_v27 = vpop.f32.mrb[3].mxu0  ;;  %v360_v37 = vadd.f32 %v352_v59, %v1903_v35 }
  0xf9   :  { %v355_v34 = vpop.f32.mrb[3].mxu1  ;;  %v1358_v36 = vmul.f32 -1.442695, %v358_v60 }
  0xfa   :  { %1434 = vpow2.f32 %v1357_v63  ;;  %v1359_v43 = vmul.f32 -1.442695, %v360_v37 }
  0xfb   :  { %1436 = vpow2.f32 %v1358_v36 }
  0xfc   :  { %1438 = vpow2.f32 %v1359_v43 }
  0xfd   :  { %1440 = vtanh.f32 %v359_v44 }
 0x104   :  { %v1435_v45 = vpop.eup %1434 }
 0x105   :  { %v1437_v46 = vpop.eup %1436  ;;  %v364_v47 = vadd.f32 1.0, %v1435_v45 }
 0x106   :  { %v370_v48 = vadd.f32 1.0, %v1437_v46  ;;  %v1439_v52 = vpop.eup %1438 }
 0x107   :  { %1442 = vrcp.f32 %v364_v47  ;;  %v1441_v41 = vpop.eup %1440  ;;  %v377_v54 = vadd.f32 1.0, %v1439_v52 }
 0x108   :  { %1444 = vrcp.f32 %v370_v48 }
 0x109   :  { %1446 = vrcp.f32 %v377_v54 }
 0x111   :  { %v1443_v42 = vpop.eup %1442 }
 0x112   :  { %v1445_v49 = vpop.eup %1444  ;;  %v381_v53 = vmul.f32 %v1443_v42, %v1441_v41 }
 0x113   :  { %v380_v56 = vmul.f32 0.0, %v1445_v49  ;;  %v1447_v55 = vpop.eup %1446 }
 0x115   :  { %v1909_v57 = vadd.f32 %v381_v53, %v380_v56 }
 0x117   :  { %1448 = vtanh.f32 %v1909_v57 }
 0x121   :  { %v1449_v58 = vpop.eup %1448 }
 0x122   :  { %v384_v59 = vmul.f32 %v1449_v58, %v1447_v55 }
 0x124   :  { %v385_v60 = vpack.c.bf16 %v384_v59, %v384_v59 }
 0x126   :  { %419 = vmatmul.mubr.bf16.vlgmr.msra.gmra.mrb[4].mxu0 %v385_v60  ;;  %460 = vmatmul.mubr.bf16.vlgmr.msra.gmra.mrb[4].mxu1 %v385_v60 }
 0x127   :  { %517 = vmatpush1.bf16.msra.mxu0 %v1671_v3  ;;  %558 = vmatpush1.bf16.msra.mxu1 %v1676_v4 }
 0x128   :  { %518 = vmatprep.subr.bf16.mxu0 %v1683_v5  ;;  %559 = vmatprep.subr.bf16.mxu1 %v1690_v6 }
 0x129   :  { %548 = vmatprep.mubr.bf16.mxu0 %v1618_v2  ;;  %589 = vmatprep.mubr.bf16.mxu1 %v1618_v2 }
 0x12b   :  { %519 = vmatpush1.bf16.msra.mxu0 %v1695_v7  ;;  %560 = vmatpush1.bf16.msra.mxu1 %v1701_v8 }
 0x12c   :  { %520 = vmatprep.subr.bf16.mxu0 %v1707_v9  ;;  %561 = vmatprep.subr.bf16.mxu1 %v1712_v10 }
 0x12f   :  { %521 = vmatpush1.bf16.msra.mxu0 %v1717_v11  ;;  %562 = vmatpush1.bf16.msra.mxu1 %v1722_v12 }
 0x130   :  { %522 = vmatprep.subr.bf16.mxu0 %v1729_v13  ;;  %563 = vmatprep.subr.bf16.mxu1 %v1736_v14 }
 0x133   :  { %523 = vmatpush1.bf16.msra.mxu0 %v1741_v15  ;;  %564 = vmatpush1.bf16.msra.mxu1 %v1748_v16 }
 0x134   :  { %524 = vmatprep.subr.bf16.mxu0 %v1753_v17  ;;  %565 = vmatprep.subr.bf16.mxu1 %v1760_v18 }
 0x137   :  { %525 = vmatpush1.bf16.msra.mxu0 %v1765_v19  ;;  %566 = vmatpush1.bf16.msra.mxu1 %v1770_v20 }
 0x138   :  { %526 = vmatprep.subr.bf16.mxu0 %v1777_v21  ;;  %567 = vmatprep.subr.bf16.mxu1 %v1784_v22 }
 0x13b   :  { %527 = vmatpush1.bf16.msra.mxu0 %v1791_v23  ;;  %568 = vmatpush1.bf16.msra.mxu1 %v1796_v24 }
 0x13c   :  { %528 = vmatprep.subr.bf16.mxu0 %v1803_v25  ;;  %569 = vmatprep.subr.bf16.mxu1 %v1808_v26 }
 0x13f   :  { %529 = vmatpush1.bf16.msra.mxu0 %v1818_v28  ;;  %570 = vmatpush1.bf16.msra.mxu1 %v1823_v29 }
 0x140   :  { %530 = vmatprep.subr.bf16.mxu0 %v1830_v30  ;;  %571 = vmatprep.subr.bf16.mxu1 %v1835_v31 }
 0x143   :  { %531 = vmatpush1.bf16.msra.mxu0 %v1842_v32  ;;  %572 = vmatpush1.bf16.msra.mxu1 %v1847_v33 }
 0x144   :  { %645 = vmatprep.subr.bf16.mxu0 %v1658_v0  ;;  %686 = vmatprep.subr.bf16.mxu1 %v1663_v1 }
 0x1f9   :  { %v420_v61 = vpop.f32.mrb[4].mxu0  ;;  %v461_v62 = vpop.f32.mrb[4].mxu1 }
 0x1fa   :  { %v472_v63 = vrot.slane %v420_v61, 7  ;;  %v422_v27 = vpop.f32.mrb[5].mxu0  ;;  %v463_v34 = vpop.f32.mrb[5].mxu1  ;;  %v474_v41 = vrot.slane %v461_v62, 7  ;;  %v504_v61 = vrot.slane %v1909_v57, 7 }
 0x1fb   :  { %v473_v36 = vrot.slane %v422_v27, 7  ;;  %v424_v38 = vpop.f32.mrb[6].mxu0  ;;  %v465_v39 = vpop.f32.mrb[6].mxu1  ;;  %v475_v48 = vrot.slane %v463_v34, 7 }
 0x1fc   :  { %v480_v37 = vadd.f32 %v472_v63, %v1897_v50  ;;  %v425_v43 = vpop.f32.mrb[7].mxu0  ;;  %v466_v44 = vpop.f32.mrb[7].mxu1  ;;  %v482_v49 = vadd.f32 %v474_v41, %v1906_v40 }
 0x1fd   :  { %v481_v45 = vadd.f32 %v473_v36, %v1899_v51  ;;  %v483_v52 = vadd.f32 %v475_v48, %v1903_v35 }
 0x1fe   :  { %v1360_v46 = vmul.f32 -1.442695, %v480_v37 }
 0x1ff   :  { %v1361_v47 = vmul.f32 -1.442695, %v481_v45  ;;  %v1362_v42 = vmul.f32 -1.442695, %v483_v52 }
 0x200   :  { %1450 = vpow2.f32 %v1360_v46 }
 0x201   :  { %1452 = vpow2.f32 %v1361_v47 }
 0x202   :  { %1454 = vpow2.f32 %v1362_v42 }
 0x203   :  { %1456 = vtanh.f32 %v482_v49 }
 0x20a   :  { %v1451_v53 = vpop.eup %1450 }
 0x20b   :  { %v1453_v54 = vpop.eup %1452  ;;  %v487_v56 = vadd.f32 1.0, %v1451_v53 }
 0x20c   :  { %v493_v55 = vadd.f32 1.0, %v1453_v54  ;;  %v1455_v58 = vpop.eup %1454 }
 0x20d   :  { %1458 = vrcp.f32 %v487_v56  ;;  %v1457_v59 = vpop.eup %1456  ;;  %v500_v34 = vadd.f32 1.0, %v1455_v58 }
 0x20e   :  { %1460 = vrcp.f32 %v493_v55 }
 0x20f   :  { %1462 = vrcp.f32 %v500_v34 }
 0x217   :  { %v1459_v60 = vpop.eup %1458 }
 0x218   :  { %v1461_v63 = vpop.eup %1460  ;;  %v507_v27 = vmul.f32 %v1459_v60, %v1457_v59 }
 0x219   :  { %v506_v62 = vmul.f32 %v1461_v63, %v504_v61  ;;  %v1463_v38 = vpop.eup %1462 }
 0x21b   :  { %v1951_v36 = vadd.f32 %v507_v27, %v506_v62 }
 0x21d   :  { %1464 = vtanh.f32 %v1951_v36 }
 0x227   :  { %v1465_v39 = vpop.eup %1464 }
 0x228   :  { %v510_v37 = vmul.f32 %v1465_v39, %v1463_v38 }
 0x22a   :  { %v511_v43 = vpack.c.bf16 %v510_v37, %v510_v37 }
 0x22c   :  { %v513_v44 = vshrl.u32 %v511_v43, 16 }
 0x22e   :  { %549 = vmatmul.mubr.bf16.vlgmr.msra.gmra.mrb[8].mxu0 %v513_v44  ;;  %590 = vmatmul.mubr.bf16.vlgmr.msra.gmra.mrb[8].mxu1 %v513_v44 }
 0x22f   :  { %646 = vmatpush1.bf16.msra.mxu0 %v1671_v3  ;;  %687 = vmatpush1.bf16.msra.mxu1 %v1676_v4 }
 0x230   :  { %647 = vmatprep.subr.bf16.mxu0 %v1683_v5  ;;  %688 = vmatprep.subr.bf16.mxu1 %v1690_v6 }
 0x231   :  { %677 = vmatprep.mubr.bf16.mxu0 %v1618_v2  ;;  %718 = vmatprep.mubr.bf16.mxu1 %v1618_v2 }
 0x233   :  { %648 = vmatpush1.bf16.msra.mxu0 %v1695_v7  ;;  %689 = vmatpush1.bf16.msra.mxu1 %v1701_v8 }
 0x234   :  { %649 = vmatprep.subr.bf16.mxu0 %v1707_v9  ;;  %690 = vmatprep.subr.bf16.mxu1 %v1712_v10 }
 0x237   :  { %650 = vmatpush1.bf16.msra.mxu0 %v1717_v11  ;;  %691 = vmatpush1.bf16.msra.mxu1 %v1722_v12 }
 0x238   :  { %651 = vmatprep.subr.bf16.mxu0 %v1729_v13  ;;  %692 = vmatprep.subr.bf16.mxu1 %v1736_v14 }
 0x23b   :  { %652 = vmatpush1.bf16.msra.mxu0 %v1741_v15  ;;  %693 = vmatpush1.bf16.msra.mxu1 %v1748_v16 }
 0x23c   :  { %653 = vmatprep.subr.bf16.mxu0 %v1753_v17  ;;  %694 = vmatprep.subr.bf16.mxu1 %v1760_v18 }
 0x23f   :  { %654 = vmatpush1.bf16.msra.mxu0 %v1765_v19  ;;  %695 = vmatpush1.bf16.msra.mxu1 %v1770_v20 }
 0x240   :  { %655 = vmatprep.subr.bf16.mxu0 %v1777_v21  ;;  %696 = vmatprep.subr.bf16.mxu1 %v1784_v22 }
 0x243   :  { %656 = vmatpush1.bf16.msra.mxu0 %v1791_v23  ;;  %697 = vmatpush1.bf16.msra.mxu1 %v1796_v24 }
 0x244   :  { %657 = vmatprep.subr.bf16.mxu0 %v1803_v25  ;;  %698 = vmatprep.subr.bf16.mxu1 %v1808_v26 }
 0x247   :  { %658 = vmatpush1.bf16.msra.mxu0 %v1818_v28  ;;  %699 = vmatpush1.bf16.msra.mxu1 %v1823_v29 }
 0x248   :  { %659 = vmatprep.subr.bf16.mxu0 %v1830_v30  ;;  %700 = vmatprep.subr.bf16.mxu1 %v1835_v31 }
 0x24b   :  { %660 = vmatpush1.bf16.msra.mxu0 %v1842_v32  ;;  %701 = vmatpush1.bf16.msra.mxu1 %v1847_v33 }
 0x24c   :  { %776 = vmatprep.subr.bf16.mxu0 %v1658_v0  ;;  %817 = vmatprep.subr.bf16.mxu1 %v1663_v1 }
 0x301   :  { %v550_v57 = vpop.f32.mrb[8].mxu0  ;;  %v591_v45 = vpop.f32.mrb[8].mxu1 }
 0x302   :  { %v602_v46 = vrot.slane %v550_v57, 6  ;;  %v552_v47 = vpop.f32.mrb[9].mxu0  ;;  %v593_v48 = vpop.f32.mrb[9].mxu1  ;;  %v604_v61 = vrot.slane %v591_v45, 6  ;;  %v634_v57 = vrot.slane %v1951_v36, 7 }
 0x303   :  { %v603_v52 = vrot.slane %v552_v47, 6  ;;  %v554_v41 = vpop.f32.mrb[10].mxu0  ;;  %v595_v42 = vpop.f32.mrb[10].mxu1  ;;  %v605_v59 = vrot.slane %v593_v48, 6 }
 0x304   :  { %v610_v49 = vadd.f32 %v602_v46, %v1897_v50  ;;  %v555_v53 = vpop.f32.mrb[11].mxu0  ;;  %v596_v54 = vpop.f32.mrb[11].mxu1  ;;  %v612_v27 = vadd.f32 %v604_v61, %v1906_v40 }
 0x305   :  { %v611_v56 = vadd.f32 %v603_v52, %v1899_v51  ;;  %v613_v60 = vadd.f32 %v605_v59, %v1903_v35 }
 0x306   :  { %v1363_v55 = vmul.f32 -1.442695, %v610_v49 }
 0x307   :  { %v1364_v58 = vmul.f32 -1.442695, %v611_v56  ;;  %v1365_v63 = vmul.f32 -1.442695, %v613_v60 }
 0x308   :  { %1466 = vpow2.f32 %v1363_v55 }
 0x309   :  { %1468 = vpow2.f32 %v1364_v58 }
 0x30a   :  { %1470 = vpow2.f32 %v1365_v63 }
 0x30b   :  { %1472 = vtanh.f32 %v612_v27 }
 0x312   :  { %v1467_v34 = vpop.eup %1466 }
 0x313   :  { %v1469_v62 = vpop.eup %1468  ;;  %v617_v38 = vadd.f32 1.0, %v1467_v34 }
 0x314   :  { %v623_v39 = vadd.f32 1.0, %v1469_v62  ;;  %v1471_v37 = vpop.eup %1470 }
 0x315   :  { %1474 = vrcp.f32 %v617_v38  ;;  %v1473_v43 = vpop.eup %1472  ;;  %v630_v48 = vadd.f32 1.0, %v1471_v37 }
 0x316   :  { %1476 = vrcp.f32 %v623_v39 }
 0x317   :  { %1478 = vrcp.f32 %v630_v48 }
 0x31f   :  { %v1475_v44 = vpop.eup %1474 }
 0x320   :  { %v1477_v46 = vpop.eup %1476  ;;  %v637_v47 = vmul.f32 %v1475_v44, %v1473_v43 }
 0x321   :  { %v636_v45 = vmul.f32 %v1477_v46, %v634_v57  ;;  %v1479_v41 = vpop.eup %1478 }
 0x323   :  { %v1993_v52 = vadd.f32 %v637_v47, %v636_v45 }
 0x325   :  { %1480 = vtanh.f32 %v1993_v52 }
 0x32f   :  { %v1481_v42 = vpop.eup %1480 }
 0x330   :  { %v640_v49 = vmul.f32 %v1481_v42, %v1479_v41 }
 0x332   :  { %v641_v53 = vpack.c.bf16 %v640_v49, %v640_v49 }
 0x334   :  { %v643_v54 = vrot.slane %v641_v53, 1 }
 0x336   :  { %678 = vmatmul.mubr.bf16.vlgmr.msra.gmra.mrb[12].mxu0 %v643_v54  ;;  %719 = vmatmul.mubr.bf16.vlgmr.msra.gmra.mrb[12].mxu1 %v643_v54 }
 0x337   :  { %777 = vmatpush1.bf16.msra.mxu0 %v1671_v3  ;;  %818 = vmatpush1.bf16.msra.mxu1 %v1676_v4 }
 0x338   :  { %778 = vmatprep.subr.bf16.mxu0 %v1683_v5  ;;  %819 = vmatprep.subr.bf16.mxu1 %v1690_v6 }
 0x339   :  { %808 = vmatprep.mubr.bf16.mxu0 %v1618_v2  ;;  %849 = vmatprep.mubr.bf16.mxu1 %v1618_v2 }
 0x33b   :  { %779 = vmatpush1.bf16.msra.mxu0 %v1695_v7  ;;  %820 = vmatpush1.bf16.msra.mxu1 %v1701_v8 }
 0x33c   :  { %780 = vmatprep.subr.bf16.mxu0 %v1707_v9  ;;  %821 = vmatprep.subr.bf16.mxu1 %v1712_v10 }
 0x33f   :  { %781 = vmatpush1.bf16.msra.mxu0 %v1717_v11  ;;  %822 = vmatpush1.bf16.msra.mxu1 %v1722_v12 }
 0x340   :  { %782 = vmatprep.subr.bf16.mxu0 %v1729_v13  ;;  %823 = vmatprep.subr.bf16.mxu1 %v1736_v14 }
 0x343   :  { %783 = vmatpush1.bf16.msra.mxu0 %v1741_v15  ;;  %824 = vmatpush1.bf16.msra.mxu1 %v1748_v16 }
 0x344   :  { %784 = vmatprep.subr.bf16.mxu0 %v1753_v17  ;;  %825 = vmatprep.subr.bf16.mxu1 %v1760_v18 }
 0x347   :  { %785 = vmatpush1.bf16.msra.mxu0 %v1765_v19  ;;  %826 = vmatpush1.bf16.msra.mxu1 %v1770_v20 }
 0x348   :  { %786 = vmatprep.subr.bf16.mxu0 %v1777_v21  ;;  %827 = vmatprep.subr.bf16.mxu1 %v1784_v22 }
 0x34b   :  { %787 = vmatpush1.bf16.msra.mxu0 %v1791_v23  ;;  %828 = vmatpush1.bf16.msra.mxu1 %v1796_v24 }
 0x34c   :  { %788 = vmatprep.subr.bf16.mxu0 %v1803_v25  ;;  %829 = vmatprep.subr.bf16.mxu1 %v1808_v26 }
 0x34f   :  { %789 = vmatpush1.bf16.msra.mxu0 %v1818_v28  ;;  %830 = vmatpush1.bf16.msra.mxu1 %v1823_v29 }
 0x350   :  { %790 = vmatprep.subr.bf16.mxu0 %v1830_v30  ;;  %831 = vmatprep.subr.bf16.mxu1 %v1835_v31 }
 0x353   :  { %791 = vmatpush1.bf16.msra.mxu0 %v1842_v32  ;;  %832 = vmatpush1.bf16.msra.mxu1 %v1847_v33 }
 0x354   :  { %905 = vmatprep.subr.bf16.mxu0 %v1658_v0  ;;  %946 = vmatprep.subr.bf16.mxu1 %v1663_v1 }
 0x409   :  { %v679_v36 = vpop.f32.mrb[12].mxu0  ;;  %v720_v56 = vpop.f32.mrb[12].mxu1 }
 0x40a   :  { %v731_v55 = vrot.slane %v679_v36, 5  ;;  %v681_v58 = vpop.f32.mrb[13].mxu0  ;;  %v722_v59 = vpop.f32.mrb[13].mxu1  ;;  %v733_v57 = vrot.slane %v720_v56, 5  ;;  %v763_v36 = vrot.slane %v1993_v52, 7 }
 0x40b   :  { %v732_v60 = vrot.slane %v681_v58, 5  ;;  %v683_v61 = vpop.f32.mrb[14].mxu0  ;;  %v724_v63 = vpop.f32.mrb[14].mxu1  ;;  %v734_v43 = vrot.slane %v722_v59, 5 }
 0x40c   :  { %v739_v27 = vadd.f32 %v731_v55, %v1897_v50  ;;  %v684_v34 = vpop.f32.mrb[15].mxu0  ;;  %v725_v62 = vpop.f32.mrb[15].mxu1  ;;  %v741_v47 = vadd.f32 %v733_v57, %v1906_v40 }
 0x40d   :  { %v740_v38 = vadd.f32 %v732_v60, %v1899_v51  ;;  %v742_v44 = vadd.f32 %v734_v43, %v1903_v35 }
 0x40e   :  { %v1366_v39 = vmul.f32 -1.442695, %v739_v27 }
 0x40f   :  { %v1367_v37 = vmul.f32 -1.442695, %v740_v38  ;;  %v1368_v46 = vmul.f32 -1.442695, %v742_v44 }
 0x410   :  { %1482 = vpow2.f32 %v1366_v39 }
 0x411   :  { %1484 = vpow2.f32 %v1367_v37 }
 0x412   :  { %1486 = vpow2.f32 %v1368_v46 }
 0x413   :  { %1488 = vtanh.f32 %v741_v47 }
 0x41a   :  { %v1483_v48 = vpop.eup %1482 }
 0x41b   :  { %v1485_v45 = vpop.eup %1484  ;;  %v746_v41 = vadd.f32 1.0, %v1483_v48 }
 0x41c   :  { %v752_v42 = vadd.f32 1.0, %v1485_v45  ;;  %v1487_v49 = vpop.eup %1486 }
 0x41d   :  { %1490 = vrcp.f32 %v746_v41  ;;  %v1489_v53 = vpop.eup %1488  ;;  %v759_v59 = vadd.f32 1.0, %v1487_v49 }
 0x41e   :  { %1492 = vrcp.f32 %v752_v42 }
 0x41f   :  { %1494 = vrcp.f32 %v759_v59 }
 0x427   :  { %v1491_v54 = vpop.eup %1490 }
 0x428   :  { %v1493_v55 = vpop.eup %1492  ;;  %v766_v58 = vmul.f32 %v1491_v54, %v1489_v53 }
 0x429   :  { %v765_v56 = vmul.f32 %v1493_v55, %v763_v36  ;;  %v1495_v61 = vpop.eup %1494 }
 0x42b   :  { %v2035_v60 = vadd.f32 %v766_v58, %v765_v56 }
 0x42d   :  { %1496 = vtanh.f32 %v2035_v60  ;;  %v894_v58 = vrot.slane %v2035_v60, 7  ;;  %v2083_v60 = vld [vmem:[%s2268_s2] ss:$16 sps:$4 sm:$0xff]  }
 0x437   :  { %v1497_v63 = vpop.eup %1496 }
 0x438   :  { %v769_v27 = vmul.f32 %v1497_v63, %v1495_v61 }
 0x43a   :  { %v770_v34 = vpack.c.bf16 %v769_v27, %v769_v27 }
 0x43c   :  { %v772_v62 = vshrl.u32 %v770_v34, 16 }
 0x43e   :  { %v774_v38 = vrot.slane %v772_v62, 1 }
 0x440   :  { %809 = vmatmul.mubr.bf16.vlgmr.msra.gmra.mrb[16].mxu0 %v774_v38  ;;  %850 = vmatmul.mubr.bf16.vlgmr.msra.gmra.mrb[16].mxu1 %v774_v38 }
 0x441   :  { %906 = vmatpush1.bf16.msra.mxu0 %v1671_v3  ;;  %947 = vmatpush1.bf16.msra.mxu1 %v1676_v4 }
 0x442   :  { %907 = vmatprep.subr.bf16.mxu0 %v1683_v5  ;;  %948 = vmatprep.subr.bf16.mxu1 %v1690_v6 }
 0x443   :  { %937 = vmatprep.mubr.bf16.mxu0 %v1618_v2  ;;  %978 = vmatprep.mubr.bf16.mxu1 %v1618_v2 }
 0x445   :  { %908 = vmatpush1.bf16.msra.mxu0 %v1695_v7  ;;  %949 = vmatpush1.bf16.msra.mxu1 %v1701_v8 }
 0x446   :  { %909 = vmatprep.subr.bf16.mxu0 %v1707_v9  ;;  %950 = vmatprep.subr.bf16.mxu1 %v1712_v10 }
 0x449   :  { %910 = vmatpush1.bf16.msra.mxu0 %v1717_v11  ;;  %951 = vmatpush1.bf16.msra.mxu1 %v1722_v12 }
 0x44a   :  { %911 = vmatprep.subr.bf16.mxu0 %v1729_v13  ;;  %952 = vmatprep.subr.bf16.mxu1 %v1736_v14 }
 0x44d   :  { %912 = vmatpush1.bf16.msra.mxu0 %v1741_v15  ;;  %953 = vmatpush1.bf16.msra.mxu1 %v1748_v16 }
 0x44e   :  { %913 = vmatprep.subr.bf16.mxu0 %v1753_v17  ;;  %954 = vmatprep.subr.bf16.mxu1 %v1760_v18 }
 0x451   :  { %914 = vmatpush1.bf16.msra.mxu0 %v1765_v19  ;;  %955 = vmatpush1.bf16.msra.mxu1 %v1770_v20 }
 0x452   :  { %915 = vmatprep.subr.bf16.mxu0 %v1777_v21  ;;  %956 = vmatprep.subr.bf16.mxu1 %v1784_v22 }
 0x455   :  { %916 = vmatpush1.bf16.msra.mxu0 %v1791_v23  ;;  %957 = vmatpush1.bf16.msra.mxu1 %v1796_v24 }
 0x456   :  { %917 = vmatprep.subr.bf16.mxu0 %v1803_v25  ;;  %958 = vmatprep.subr.bf16.mxu1 %v1808_v26 }
 0x459   :  { %918 = vmatpush1.bf16.msra.mxu0 %v1818_v28  ;;  %959 = vmatpush1.bf16.msra.mxu1 %v1823_v29 }
 0x45a   :  { %919 = vmatprep.subr.bf16.mxu0 %v1830_v30  ;;  %960 = vmatprep.subr.bf16.mxu1 %v1835_v31 }
 0x45d   :  { %920 = vmatpush1.bf16.msra.mxu0 %v1842_v32  ;;  %961 = vmatpush1.bf16.msra.mxu1 %v1847_v33 }
 0x45e   :  { %1036 = vmatprep.subr.bf16.mxu0 %v1658_v0  ;;  %1077 = vmatprep.subr.bf16.mxu1 %v1663_v1 }
 0x513   :  { %v810_v3 = vpop.f32.mrb[16].mxu0  ;;  %v851_v4 = vpop.f32.mrb[16].mxu1 }
 0x514   :  { %v862_v5 = vrot.slane %v810_v3, 4  ;;  %v812_v6 = vpop.f32.mrb[17].mxu0  ;;  %v853_v7 = vpop.f32.mrb[17].mxu1  ;;  %v864_v1 = vrot.slane %v851_v4, 4 }
 0x515   :  { %v863_v8 = vrot.slane %v812_v6, 4  ;;  %v814_v9 = vpop.f32.mrb[18].mxu0  ;;  %v855_v52 = vpop.f32.mrb[18].mxu1  ;;  %v865_v47 = vrot.slane %v853_v7, 4  ;;  %v2095_v6 = vld [vmem:[%s2268_s2 + $0x24] ss:$16 sps:$4 sm:$0xff]  }
 0x516   :  { %v870_v39 = vadd.f32 %v862_v5, %v1897_v50  ;;  %v815_v37 = vpop.f32.mrb[19].mxu0  ;;  %v856_v43 = vpop.f32.mrb[19].mxu1  ;;  %v872_v45 = vadd.f32 %v864_v1, %v1906_v40  ;;  %v2089_v5 = vld [vmem:[%s2268_s2 + $0x8] ss:$16 sps:$4 sm:$0xff]   ;;  %v2101_v7 = vld [vmem:[%s2268_s2 + $0x2c] ss:$16 sps:$4 sm:$0xff]  }
 0x517   :  { %v871_v44 = vadd.f32 %v863_v8, %v1899_v51  ;;  %v873_v0 = vadd.f32 %v865_v47, %v1903_v35  ;;  %v2109_v8 = vld [vmem:[%s2268_s2 + $0x20] ss:$16 sps:$4 sm:$0xff]   ;;  %v2115_v9 = vld [vmem:[%s2268_s2 + $0x28] ss:$16 sps:$4 sm:$0xff]   ;;  %v2121_v52 = vld [vmem:[%s2268_s2 + $0x44] ss:$16 sps:$4 sm:$0xff]  }
 0x518   :  { %v1369_v57 = vmul.f32 -1.442695, %v870_v39 }
 0x519   :  { %v1370_v46 = vmul.f32 -1.442695, %v871_v44  ;;  %v1371_v48 = vmul.f32 -1.442695, %v873_v0 }
 0x51a   :  { %1498 = vpow2.f32 %v1369_v57 }
 0x51b   :  { %1500 = vpow2.f32 %v1370_v46 }
 0x51c   :  { %1502 = vpow2.f32 %v1371_v48 }
 0x51d   :  { %1504 = vtanh.f32 %v872_v45 }
 0x524   :  { %v1499_v41 = vpop.eup %1498 }
 0x525   :  { %v1501_v42 = vpop.eup %1500  ;;  %v877_v49 = vadd.f32 1.0, %v1499_v41 }
 0x526   :  { %v883_v53 = vadd.f32 1.0, %v1501_v42  ;;  %v1503_v54 = vpop.eup %1502 }
 0x527   :  { %1506 = vrcp.f32 %v877_v49  ;;  %v1505_v36 = vpop.eup %1504  ;;  %v890_v61 = vadd.f32 1.0, %v1503_v54 }
 0x528   :  { %1508 = vrcp.f32 %v883_v53 }
 0x529   :  { %1510 = vrcp.f32 %v890_v61  ;;  %v1576_v61 = vld [vmem:[%s2268_s2 + $0x60] ss:$16 sps:$4 sm:$0xff]  }
 0x531   :  { %v1507_v55 = vpop.eup %1506 }
 0x532   :  { %v1509_v59 = vpop.eup %1508  ;;  %v897_v56 = vmul.f32 %v1507_v55, %v1505_v36  ;;  %v1571_v55 = vld [vmem:[%s2268_s2 + $0x4c] ss:$16 sps:$4 sm:$0xff]  }
 0x533   :  { %v896_v63 = vmul.f32 %v1509_v59, %v894_v58  ;;  %v1511_v34 = vpop.eup %1510  ;;  %v1572_v58 = vld [vmem:[%s2268_s2 + $0x40] ss:$16 sps:$4 sm:$0xff]   ;;  %v1574_v59 = vld [vmem:[%s2268_s2 + $0x64] ss:$16 sps:$4 sm:$0xff]  }
 0x535   :  { %v2077_v27 = vadd.f32 %v897_v56, %v896_v63  ;;  %v1575_v56 = vld [vmem:[%s2268_s2 + $0x6c] ss:$16 sps:$4 sm:$0xff]   ;;  %v1577_v63 = vld [vmem:[%s2268_s2 + $0x68] ss:$16 sps:$4 sm:$0xff]  }
 0x537   :  { %1512 = vtanh.f32 %v2077_v27  ;;  %v1023_v46 = vrot.slane %v2077_v27, 7  ;;  %v1578_v27 = vld [vmem:[%s2268_s2 + $0x84] ss:$16 sps:$4 sm:$0xff]  }
 0x541   :  { %v1513_v62 = vpop.eup %1512 }
 0x542   :  { %v900_v38 = vmul.f32 %v1513_v62, %v1511_v34  ;;  %v1579_v34 = vld [vmem:[%s2268_s2 + $0x8c] ss:$16 sps:$4 sm:$0xff]   ;;  %v1580_v62 = vld [vmem:[%s2268_s2 + $0x80] ss:$16 sps:$4 sm:$0xff]  }
 0x544   :  { %v901_v3 = vpack.c.bf16 %v900_v38, %v900_v38  ;;  %v1581_v38 = vld [vmem:[%s2268_s2 + $0x88] ss:$16 sps:$4 sm:$0xff]  }
 0x546   :  { %v903_v4 = vrot.slane %v901_v3, 2  ;;  %v1582_v3 = vld [vmem:[%s2268_s2 + $0xa4] ss:$16 sps:$4 sm:$0xff]  }
 0x548   :  { %938 = vmatmul.mubr.bf16.vlgmr.msra.gmra.mrb[20].mxu0 %v903_v4  ;;  %979 = vmatmul.mubr.bf16.vlgmr.msra.gmra.mrb[20].mxu1 %v903_v4  ;;  %v1583_v4 = vld [vmem:[%s2268_s2 + $0xac] ss:$16 sps:$4 sm:$0xff]  }
 0x549   :  { %1037 = vmatpush1.bf16.msra.mxu0 %v2083_v60  ;;  %1078 = vmatpush1.bf16.msra.mxu1 %v2089_v5 }
 0x54a   :  { %1038 = vmatprep.subr.bf16.mxu0 %v2095_v6  ;;  %1079 = vmatprep.subr.bf16.mxu1 %v2101_v7 }
 0x54b   :  { %1068 = vmatprep.mubr.bf16.mxu0 %v1618_v2  ;;  %1109 = vmatprep.mubr.bf16.mxu1 %v1618_v2 }
 0x54d   :  { %1039 = vmatpush1.bf16.msra.mxu0 %v2109_v8  ;;  %1080 = vmatpush1.bf16.msra.mxu1 %v2115_v9 }
 0x54e   :  { %1040 = vmatprep.subr.bf16.mxu0 %v2121_v52  ;;  %1081 = vmatprep.subr.bf16.mxu1 %v1712_v10  ;;  %v1569_v10 = vld [vmem:[%s2268_s2 + $0x4] ss:$16 sps:$4 sm:$0xff]  }
 0x551   :  { %1041 = vmatpush1.bf16.msra.mxu0 %v1717_v11  ;;  %1082 = vmatpush1.bf16.msra.mxu1 %v1722_v12  ;;  %v1570_v11 = vld [vmem:[%s2268_s2 + $0xc] ss:$16 sps:$4 sm:$0xff]  }
 0x552   :  { %1042 = vmatprep.subr.bf16.mxu0 %v1729_v13  ;;  %1083 = vmatprep.subr.bf16.mxu1 %v1736_v14 }
 0x555   :  { %1043 = vmatpush1.bf16.msra.mxu0 %v1741_v15  ;;  %1084 = vmatpush1.bf16.msra.mxu1 %v1748_v16 }
 0x556   :  { %1044 = vmatprep.subr.bf16.mxu0 %v1753_v17  ;;  %1085 = vmatprep.subr.bf16.mxu1 %v1760_v18 }
 0x559   :  { %1045 = vmatpush1.bf16.msra.mxu0 %v1765_v19  ;;  %1086 = vmatpush1.bf16.msra.mxu1 %v1770_v20 }
 0x55a   :  { %1046 = vmatprep.subr.bf16.mxu0 %v1777_v21  ;;  %1087 = vmatprep.subr.bf16.mxu1 %v1784_v22 }
 0x55d   :  { %1047 = vmatpush1.bf16.msra.mxu0 %v1791_v23  ;;  %1088 = vmatpush1.bf16.msra.mxu1 %v1796_v24 }
 0x55e   :  { %1048 = vmatprep.subr.bf16.mxu0 %v1803_v25  ;;  %1089 = vmatprep.subr.bf16.mxu1 %v1808_v26 }
 0x561   :  { %1049 = vmatpush1.bf16.msra.mxu0 %v1818_v28  ;;  %1090 = vmatpush1.bf16.msra.mxu1 %v1823_v29 }
 0x562   :  { %1050 = vmatprep.subr.bf16.mxu0 %v1830_v30  ;;  %1091 = vmatprep.subr.bf16.mxu1 %v1835_v31 }
 0x565   :  { %1051 = vmatpush1.bf16.msra.mxu0 %v1842_v32  ;;  %1092 = vmatpush1.bf16.msra.mxu1 %v1847_v33 }
 0x566   :  { %1165 = vmatprep.subr.bf16.mxu0 %v1569_v10  ;;  %1206 = vmatprep.subr.bf16.mxu1 %v1570_v11  ;;  %v1591_v10 = vld [vmem:[%s2268_s2 + $0xec] ss:$16 sps:$4 sm:$0xff]   ;;  %v1592_v11 = vld [vmem:[%s2268_s2 + $0xe0] ss:$16 sps:$4 sm:$0xff]  }
 0x61b   :  { %v939_v12 = vpop.f32.mrb[20].mxu0  ;;  %v980_v13 = vpop.f32.mrb[20].mxu1 }
 0x61c   :  { %v991_v14 = vrot.slane %v939_v12, 3  ;;  %v941_v15 = vpop.f32.mrb[21].mxu0  ;;  %v982_v16 = vpop.f32.mrb[21].mxu1  ;;  %v993_v29 = vrot.slane %v980_v13, 3  ;;  %v1593_v12 = vld [vmem:[%s2268_s2 + $0xe8] ss:$16 sps:$4 sm:$0xff]  }
 0x61d   :  { %v992_v17 = vrot.slane %v941_v15, 3  ;;  %v943_v18 = vpop.f32.mrb[22].mxu0  ;;  %v984_v19 = vpop.f32.mrb[22].mxu1  ;;  %v994_v26 = vrot.slane %v982_v16, 3 }
 0x61e   :  { %v999_v20 = vadd.f32 %v991_v14, %v1897_v50  ;;  %v944_v21 = vpop.f32.mrb[23].mxu0  ;;  %v985_v22 = vpop.f32.mrb[23].mxu1  ;;  %v1001_v31 = vadd.f32 %v993_v29, %v1906_v40 }
 0x61f   :  { %v1000_v23 = vadd.f32 %v992_v17, %v1899_v51  ;;  %v1002_v28 = vadd.f32 %v994_v26, %v1903_v35 }
 0x620   :  { %v1372_v24 = vmul.f32 -1.442695, %v999_v20 }
 0x621   :  { %v1373_v25 = vmul.f32 -1.442695, %v1000_v23  ;;  %v1374_v30 = vmul.f32 -1.442695, %v1002_v28 }
 0x622   :  { %1514 = vpow2.f32 %v1372_v24 }
 0x623   :  { %1516 = vpow2.f32 %v1373_v25 }
 0x624   :  { %1518 = vpow2.f32 %v1374_v30 }
 0x625   :  { %1520 = vtanh.f32 %v1001_v31 }
 0x62c   :  { %v1515_v32 = vpop.eup %1514 }
 0x62d   :  { %v1517_v33 = vpop.eup %1516  ;;  %v1006_v39 = vadd.f32 1.0, %v1515_v32 }
 0x62e   :  { %v1012_v37 = vadd.f32 1.0, %v1517_v33  ;;  %v1519_v43 = vpop.eup %1518 }
 0x62f   :  { %1522 = vrcp.f32 %v1006_v39  ;;  %v1521_v44 = vpop.eup %1520  ;;  %v1019_v1 = vadd.f32 1.0, %v1519_v43 }
 0x630   :  { %1524 = vrcp.f32 %v1012_v37 }
 0x631   :  { %1526 = vrcp.f32 %v1019_v1 }
 0x639   :  { %v1523_v57 = vpop.eup %1522 }
 0x63a   :  { %v1525_v47 = vpop.eup %1524  ;;  %v1026_v0 = vmul.f32 %v1523_v57, %v1521_v44 }
 0x63b   :  { %v1025_v48 = vmul.f32 %v1525_v47, %v1023_v46  ;;  %v1527_v41 = vpop.eup %1526 }
 0x63d   :  { %v2158_v45 = vadd.f32 %v1026_v0, %v1025_v48 }
 0x63f   :  { %1528 = vtanh.f32 %v2158_v45  ;;  %v1154_v47 = vrot.slane %v2158_v45, 7 }
 0x649   :  { %v1529_v42 = vpop.eup %1528 }
 0x64a   :  { %v1029_v49 = vmul.f32 %v1529_v42, %v1527_v41 }
 0x64c   :  { %v1030_v53 = vpack.c.bf16 %v1029_v49, %v1029_v49 }
 0x64e   :  { %v1032_v54 = vshrl.u32 %v1030_v53, 16 }
 0x650   :  { %v1034_v36 = vrot.slane %v1032_v54, 2 }
 0x652   :  { %1069 = vmatmul.mubr.bf16.vlgmr.msra.gmra.mrb[24].mxu0 %v1034_v36  ;;  %1110 = vmatmul.mubr.bf16.vlgmr.msra.gmra.mrb[24].mxu1 %v1034_v36 }
 0x653   :  { %1166 = vmatpush1.bf16.msra.mxu0 %v2083_v60  ;;  %1207 = vmatpush1.bf16.msra.mxu1 %v2089_v5  ;;  %v1584_v60 = vld [vmem:[%s2268_s2 + $0xa0] ss:$16 sps:$4 sm:$0xff]   ;;  %v1585_v5 = vld [vmem:[%s2268_s2 + $0xa8] ss:$16 sps:$4 sm:$0xff]  }
 0x654   :  { %1167 = vmatprep.subr.bf16.mxu0 %v2095_v6  ;;  %1208 = vmatprep.subr.bf16.mxu1 %v2101_v7  ;;  %v1586_v6 = vld [vmem:[%s2268_s2 + $0xc4] ss:$16 sps:$4 sm:$0xff]   ;;  %v1587_v7 = vld [vmem:[%s2268_s2 + $0xcc] ss:$16 sps:$4 sm:$0xff]  }
 0x655   :  { %1197 = vmatprep.mubr.bf16.mxu0 %v1618_v2  ;;  %1238 = vmatprep.mubr.bf16.mxu1 %v1618_v2  ;;  %v1573_v2 = vld [vmem:[%s2268_s2 + $0x48] ss:$16 sps:$4 sm:$0xff]  }
 0x657   :  { %1168 = vmatpush1.bf16.msra.mxu0 %v2109_v8  ;;  %1209 = vmatpush1.bf16.msra.mxu1 %v2115_v9  ;;  %v1588_v8 = vld [vmem:[%s2268_s2 + $0xc0] ss:$16 sps:$4 sm:$0xff]   ;;  %v1589_v9 = vld [vmem:[%s2268_s2 + $0xc8] ss:$16 sps:$4 sm:$0xff]  }
 0x658   :  { %1169 = vmatprep.subr.bf16.mxu0 %v2121_v52  ;;  %1210 = vmatprep.subr.bf16.mxu1 %v1571_v55  ;;  %v1590_v52 = vld [vmem:[%s2268_s2 + $0xe4] ss:$16 sps:$4 sm:$0xff]  }
 0x65b   :  { %1170 = vmatpush1.bf16.msra.mxu0 %v1572_v58  ;;  %1211 = vmatpush1.bf16.msra.mxu1 %v1573_v2 }
 0x65c   :  { %1171 = vmatprep.subr.bf16.mxu0 %v1574_v59  ;;  %1212 = vmatprep.subr.bf16.mxu1 %v1575_v56 }
 0x65f   :  { %1172 = vmatpush1.bf16.msra.mxu0 %v1576_v61  ;;  %1213 = vmatpush1.bf16.msra.mxu1 %v1577_v63 }
 0x660   :  { %1173 = vmatprep.subr.bf16.mxu0 %v1578_v27  ;;  %1214 = vmatprep.subr.bf16.mxu1 %v1579_v34 }
 0x663   :  { %1174 = vmatpush1.bf16.msra.mxu0 %v1580_v62  ;;  %1215 = vmatpush1.bf16.msra.mxu1 %v1581_v38 }
 0x664   :  { %1175 = vmatprep.subr.bf16.mxu0 %v1582_v3  ;;  %1216 = vmatprep.subr.bf16.mxu1 %v1583_v4 }
 0x667   :  { %1176 = vmatpush1.bf16.msra.mxu0 %v1584_v60  ;;  %1217 = vmatpush1.bf16.msra.mxu1 %v1585_v5 }
 0x668   :  { %1177 = vmatprep.subr.bf16.mxu0 %v1586_v6  ;;  %1218 = vmatprep.subr.bf16.mxu1 %v1587_v7 }
 0x66b   :  { %1178 = vmatpush1.bf16.msra.mxu0 %v1588_v8  ;;  %1219 = vmatpush1.bf16.msra.mxu1 %v1589_v9 }
 0x66c   :  { %1179 = vmatprep.subr.bf16.mxu0 %v1590_v52  ;;  %1220 = vmatprep.subr.bf16.mxu1 %v1591_v10 }
 0x66f   :  { %1180 = vmatpush1.bf16.msra.mxu0 %v1592_v11  ;;  %1221 = vmatpush1.bf16.msra.mxu1 %v1593_v12 }
 0x725   :  { %v1070_v13 = vpop.f32.mrb[24].mxu0  ;;  %v1111_v14 = vpop.f32.mrb[24].mxu1 }
 0x726   :  { %v1122_v15 = vrot.slane %v1070_v13, 2  ;;  %v1072_v16 = vpop.f32.mrb[25].mxu0  ;;  %v1113_v17 = vpop.f32.mrb[25].mxu1  ;;  %v1124_v30 = vrot.slane %v1111_v14, 2 }
 0x727   :  { %v1123_v18 = vrot.slane %v1072_v16, 2  ;;  %v1074_v19 = vpop.f32.mrb[26].mxu0  ;;  %v1115_v20 = vpop.f32.mrb[26].mxu1  ;;  %v1125_v28 = vrot.slane %v1113_v17, 2 }
 0x728   :  { %v1130_v21 = vadd.f32 %v1122_v15, %v1897_v50  ;;  %v1075_v22 = vpop.f32.mrb[27].mxu0  ;;  %v1116_v23 = vpop.f32.mrb[27].mxu1  ;;  %v1132_v32 = vadd.f32 %v1124_v30, %v1906_v40  ;;  %v1381_v20 = vld [vmem:[%s2270_s4] ss:$0 sm:$0xff] }
 0x729   :  { %v1131_v24 = vadd.f32 %v1123_v18, %v1899_v51  ;;  %v1133_v29 = vadd.f32 %v1125_v28, %v1903_v35 }
 0x72a   :  { %v1375_v25 = vmul.f32 -1.442695, %v1130_v21 }
 0x72b   :  { %v1376_v26 = vmul.f32 -1.442695, %v1131_v24  ;;  %v1377_v31 = vmul.f32 -1.442695, %v1133_v29  ;;  %v1382_v24 = vld [vmem:[%s2271_s5] ss:$0 sm:$0xff] }
 0x72c   :  { %1530 = vpow2.f32 %v1375_v25 }
 0x72d   :  { %1532 = vpow2.f32 %v1376_v26 }
 0x72e   :  { %1534 = vpow2.f32 %v1377_v31 }
 0x72f   :  { %1536 = vtanh.f32 %v1132_v32 }
 0x736   :  { %v1531_v33 = vpop.eup %1530 }
 0x737   :  { %v1533_v39 = vpop.eup %1532  ;;  %v1137_v37 = vadd.f32 1.0, %v1531_v33 }
 0x738   :  { %v1143_v43 = vadd.f32 1.0, %v1533_v39  ;;  %v1535_v44 = vpop.eup %1534 }
 0x739   :  { %1538 = vrcp.f32 %v1137_v37  ;;  %v1537_v57 = vpop.eup %1536  ;;  %v1150_v48 = vadd.f32 1.0, %v1535_v44 }
 0x73a   :  { %1540 = vrcp.f32 %v1143_v43 }
 0x73b   :  { %1542 = vrcp.f32 %v1150_v48 }
 0x743   :  { %v1539_v46 = vpop.eup %1538 }
 0x744   :  { %v1541_v0 = vpop.eup %1540  ;;  %v1157_v1 = vmul.f32 %v1539_v46, %v1537_v57 }
 0x745   :  { %v1156_v41 = vmul.f32 %v1541_v0, %v1154_v47  ;;  %v1543_v49 = vpop.eup %1542 }
 0x747   :  { %v1158_v42 = vadd.f32 %v1157_v1, %v1156_v41 }
 0x749   :  { %1544 = vtanh.f32 %v1158_v42  ;;  %v1283_v14 = vrot.slane %v1158_v42, 7 }
 0x753   :  { %v1545_v53 = vpop.eup %1544 }
 0x754   :  { %v1160_v54 = vmul.f32 %v1545_v53, %v1543_v49 }
 0x756   :  { %v1161_v36 = vpack.c.bf16 %v1160_v54, %v1160_v54 }
 0x758   :  { %v1163_v55 = vrot.slane %v1161_v36, 3 }
 0x75a   :  { %1198 = vmatmul.mubr.bf16.vlgmr.msra.gmra.mrb[28].mxu0 %v1163_v55  ;;  %1239 = vmatmul.mubr.bf16.vlgmr.msra.gmra.mrb[28].mxu1 %v1163_v55 }
 0x82d   :  { %v1199_v58 = vpop.f32.mrb[28].mxu0  ;;  %v1240_v2 = vpop.f32.mrb[28].mxu1 }
 0x82e   :  { %v1251_v59 = vrot.slane %v1199_v58, 1  ;;  %v1201_v56 = vpop.f32.mrb[29].mxu0  ;;  %v1242_v61 = vpop.f32.mrb[29].mxu1  ;;  %v1253_v7 = vrot.slane %v1240_v2, 1 }
 0x82f   :  { %v1252_v45 = vrot.slane %v1201_v56, 1  ;;  %v1203_v63 = vpop.f32.mrb[30].mxu0  ;;  %v1244_v27 = vpop.f32.mrb[30].mxu1  ;;  %v1254_v5 = vrot.slane %v1242_v61, 1 }
 0x830   :  { %v1259_v34 = vadd.f32 %v1251_v59, %v1897_v50  ;;  %v1204_v62 = vpop.f32.mrb[31].mxu0  ;;  %v1245_v38 = vpop.f32.mrb[31].mxu1  ;;  %v1261_v9 = vadd.f32 %v1253_v7, %v1906_v40 }
 0x831   :  { %v1260_v3 = vadd.f32 %v1252_v45, %v1899_v51  ;;  %v1262_v6 = vadd.f32 %v1254_v5, %v1903_v35 }
 0x832   :  { %v1378_v4 = vmul.f32 -1.442695, %v1259_v34 }
 0x833   :  { %v1379_v60 = vmul.f32 -1.442695, %v1260_v3  ;;  %v1380_v8 = vmul.f32 -1.442695, %v1262_v6 }
 0x834   :  { %1546 = vpow2.f32 %v1378_v4 }
 0x835   :  { %1548 = vpow2.f32 %v1379_v60 }
 0x836   :  { %1550 = vpow2.f32 %v1380_v8 }
 0x837   :  { %1552 = vtanh.f32 %v1261_v9 }
 0x83e   :  { %v1547_v52 = vpop.eup %1546 }
 0x83f   :  { %v1549_v10 = vpop.eup %1548  ;;  %v1266_v11 = vadd.f32 1.0, %v1547_v52 }
 0x840   :  { %v1272_v50 = vadd.f32 1.0, %v1549_v10  ;;  %v1551_v51 = vpop.eup %1550 }
 0x841   :  { %1554 = vrcp.f32 %v1266_v11  ;;  %v1553_v12 = vpop.eup %1552  ;;  %v1279_v17 = vadd.f32 1.0, %v1551_v51 }
 0x842   :  { %1556 = vrcp.f32 %v1272_v50 }
 0x843   :  { %1558 = vrcp.f32 %v1279_v17 }
 0x84b   :  { %v1555_v13 = vpop.eup %1554 }
 0x84c   :  { %v1557_v15 = vpop.eup %1556  ;;  %v1286_v16 = vmul.f32 %v1555_v13, %v1553_v12 }
 0x84d   :  { %v1285_v35 = vmul.f32 %v1557_v15, %v1283_v14  ;;  %v1559_v40 = vpop.eup %1558 }
 0x84f   :  { %v1287_v18 = vadd.f32 %v1286_v16, %v1285_v35 }
 0x851   :  { %1560 = vtanh.f32 %v1287_v18 }
 0x85b   :  { %v1561_v19 = vpop.eup %1560 }
 0x85c   :  { %v1289_v21 = vmul.f32 %v1561_v19, %v1559_v40 }
 0x85e   :  { %v1297_v22 = vmul.f32 %v1381_v20, %v1289_v21 }
 0x860   :  { %v1299_v23 = vsel %vm1298_vm0, %v1297_v22, 0.0 }
 0x861   :  { %1300 = vadd.xlane.f32.xlu0 %v1299_v23 }
 0x8ee   :  { %v1301_v25 = vpop.xlane.xlu0 %1300 }
 0x8ef   :  { %v1309_v26 = vadd.f32 %v1382_v24, %v1301_v25 }
 0x8f1   :  { %1310 = vst [vmem:[#allocation2 - $0x7] sm:$0x80] %v1309_v26 }
 0x8f2   :  { %1605 = shalt.err (!%p1602_p4)
}
 0x8f3   :  { %s1606_s9 = scalar_lea.hbm %s2272_s6, 16 }
 0x8f4   :  { %p1607_p5 = scmp.ne.s32.totalorder %s2272_s6, %s1606_s9  ;;  %p1610_p6 = scmp.lt.u32.totalorder %s1606_s9, %s2272_s6 }
 0x8f6   :  { %p1612_p7 = pnand %p1610_p6, %p1607_p5 }
 0x8f8   :  { %1615 = shalt.err (!%p1612_p7)
}
 0x8f9   :  { %1320 = dma.vmem_to_hbm [thread:$0]  %s1318_s30, 16, %s2272_s6, [#allocation3]  }
 0x8fa   :  { %1616 = dma.done.wait [#allocation3], 16  }
 0x8fb   :  { %1617 = vsyncadd [#allocation3], 4294967280 }
 0x8fc   :  { %1324 = vsyncpa [#allocation3], 1 }

</bundles_post_ra>
